<compile_context>
chip_gen: v5e
topology: v5e:2x2
jax: 0.10.0
libtpu: 0.0.40
codegen_flags: <defaults>
</compile_context>

<pallas_src>
import functools

import numpy as np
import jax
import jax.numpy as jnp
from jax import lax
from jax.experimental import pallas as pl
from jax.experimental.pallas import tpu as pltpu

BN_EPS = 1e-5


# --------------------------------------------------------------------------
# Host-side constant builders (trace-time numpy; baked into the program)
# --------------------------------------------------------------------------
def _interp_matrix_np(n_in, n_out):
    """1-D bilinear interpolation matrix (n_out, n_in), align_corners=True."""
    if n_in == 1:
        return np.ones((n_out, 1), np.float32)
    i = np.arange(n_out, dtype=np.float64)
    s = i * (n_in - 1) / (n_out - 1)
    i0 = np.clip(np.floor(s).astype(np.int64), 0, n_in - 2)
    w1 = (s - i0).astype(np.float32)
    w0 = 1.0 - w1
    m = np.zeros((n_out, n_in), np.float32)
    m[np.arange(n_out), i0] += w0
    m[np.arange(n_out), i0 + 1] += w1
    return m


def _upsample_pad_matrix_np(h1, w1, H, W):
    """(h1*w1, H*W) matrix: flat(x1) @ M == flat(pad(upsample_x2(x1)))."""
    Mh = _interp_matrix_np(h1, 2 * h1)            # (2*h1, h1)
    Mw = _interp_matrix_np(w1, 2 * w1)            # (2*w1, w1)
    dY, dX = H - 2 * h1, W - 2 * w1
    MhP = np.zeros((H, h1), np.float32)
    MhP[dY // 2: dY // 2 + 2 * h1, :] = Mh
    MwP = np.zeros((W, w1), np.float32)
    MwP[dX // 2: dX // 2 + 2 * w1, :] = Mw
    # kron(MhP, MwP)[Y*W+X, y*w1+x] = MhP[Y, y] * MwP[X, x]
    return np.ascontiguousarray(np.kron(MhP, MwP).T.astype(np.float32))


def _tap_masks_np(H, W):
    """(9, H*W) {0,1} validity masks for the 3x3 taps, tap=(dy+1)*3+(dx+1)."""
    ys = np.repeat(np.arange(H), W)
    xs = np.tile(np.arange(W), H)
    rows = []
    for dy in (-1, 0, 1):
        for dx in (-1, 0, 1):
            ok = (ys + dy >= 0) & (ys + dy < H) & (xs + dx >= 0) & (xs + dx < W)
            rows.append(ok.astype(np.float32))
    return np.stack(rows)


# --------------------------------------------------------------------------
# Fused Pallas kernel: upsample+pad+concat + DoubleConvDSC (2x DSC+BN+ReLU)
# --------------------------------------------------------------------------
def _updsc_fused_kernel(x2_ref, x1_ref, up_ref, mask_ref,
                        wd1_ref, bd1_ref, wp1_ref, s1_ref, t1_ref,
                        wd2_ref, bd2_ref, wp2_ref, s2_ref, t2_ref,
                        out_ref, *, W):
    # x2_ref : (1, C2, HW)    skip connection, spatial flattened on lanes
    # x1_ref : (1, C1, h1w1)  decoder feature (pre-upsample), flattened
    # up_ref : (h1w1, HW)     upsample+pad matrix (constant)
    # mask_ref: (9, HW)       3x3 tap boundary masks (constant)
    # wd*    : (C, 9)         depthwise weights, tap = (dy+1)*3+(dx+1)
    # bd*    : (C, 1)         depthwise bias
    # wp*    : (Co, C)        pointwise weights
    # s*/t*  : (Co, 1)        folded BN scale / shift (incl. pointwise bias)
    # out_ref: (1, Cout, HW)
    HW = x2_ref.shape[2]
    C2 = x2_ref.shape[1]
    masks = mask_ref[...]                                   # (9, HW)

    def depthwise3x3(x, wd):
        # x: (C, HW); wd: (C, 9). Taps via XLU lane rolls + boundary masks.
        acc = x * wd[:, 4:5]                                # center tap
        for dy in (-1, 0, 1):
            for dx in (-1, 0, 1):
                if dy == 0 and dx == 0:
                    continue
                tap = (dy + 1) * 3 + (dx + 1)
                shift = (-(dy * W + dx)) % HW               # static python int
                shifted = pltpu.roll(x, shift, 1)           # shifted[p]=x[p+dy*W+dx]
                acc = acc + shifted * masks[tap:tap + 1, :] * wd[:, tap:tap + 1]
        return acc

    # ---- bilinear upsample + pad of x1, as one matmul on flat spatial ----
    up = jnp.dot(x1_ref[0], up_ref[...],
                 preferred_element_type=jnp.float32)        # (C1, HW)
    x2 = x2_ref[0]                                          # (C2, HW)

    # ---- block 1 on concat([x2, up]) without materializing the concat ----
    wd1 = wd1_ref[...]
    bd1 = bd1_ref[...]
    wp1 = wp1_ref[...]
    acc_a = depthwise3x3(x2, wd1[:C2, :]) + bd1[:C2, :]     # (C2, HW)
    acc_b = depthwise3x3(up, wd1[C2:, :]) + bd1[C2:, :]     # (C1, HW)
    z1 = (jnp.dot(wp1[:, :C2], acc_a, preferred_element_type=jnp.float32)
          + jnp.dot(wp1[:, C2:], acc_b, preferred_element_type=jnp.float32))
    y1 = jnp.maximum(z1 * s1_ref[...] + t1_ref[...], 0.0)   # (Cmid, HW), VMEM-resident

    # ---- block 2 ----
    acc2 = depthwise3x3(y1, wd2_ref[...]) + bd2_ref[...]    # (Cmid, HW)
    z2 = jnp.dot(wp2_ref[...], acc2, preferred_element_type=jnp.float32)
    out_ref[0] = jnp.maximum(z2 * s2_ref[...] + t2_ref[...], 0.0)


# --------------------------------------------------------------------------
# Parameter construction (PyTorch shapes) + folding into kernel layout
# --------------------------------------------------------------------------
def make_conv_dsc_params(key, cin, cout):
    k1, k2, k3, k4 = jax.random.split(key, 4)
    wd_pt = 0.2 * jax.random.normal(k1, (cin, 1, 3, 3), jnp.float32)
    bd = 0.1 * jax.random.normal(k2, (cin,), jnp.float32)
    wp_pt = 0.2 * jax.random.normal(k3, (cout, cin, 1, 1), jnp.float32)
    bp = 0.1 * jax.random.normal(k4, (cout,), jnp.float32)
    return dict(wd_pt=wd_pt, bd=bd, wp_pt=wp_pt, bp=bp)


def make_bn_params(key, c):
    k1, k2, k3, k4 = jax.random.split(key, 4)
    return dict(
        gamma=1.0 + 0.1 * jax.random.normal(k1, (c,), jnp.float32),
        beta=0.1 * jax.random.normal(k2, (c,), jnp.float32),
        mean=0.1 * jax.random.normal(k3, (c,), jnp.float32),
        var=jax.random.uniform(k4, (c,), jnp.float32, 0.5, 1.5),
    )


def fold_block_params(conv_p, bn_p):
    cin = conv_p["wd_pt"].shape[0]
    cout = conv_p["wp_pt"].shape[0]
    wd = conv_p["wd_pt"][:, 0].reshape(cin, 9)          # (Cin, 9), tap=kh*3+kw
    bd = conv_p["bd"].reshape(cin, 1)                   # (Cin, 1)
    wp = conv_p["wp_pt"][:, :, 0, 0]                    # (Cout, Cin)
    s = bn_p["gamma"] / jnp.sqrt(bn_p["var"] + BN_EPS)
    shift = (conv_p["bp"] - bn_p["mean"]) * s + bn_p["beta"]
    return wd, bd, wp, s.reshape(cout, 1), shift.reshape(cout, 1)


# --------------------------------------------------------------------------
# UpDSC forward (bilinear=True path) — one fused pallas_call
# --------------------------------------------------------------------------
def updsc_forward(x1, x2, params):
    # x1: (B, C1, h1, w1) decoder feature; x2: (B, C2, H, W) skip. NCHW f32.
    B, C1, h1, w1 = x1.shape
    _, C2, H, W = x2.shape
    Cin = C1 + C2
    HW, h1w1 = H * W, h1 * w1

    wd1, bd1, wp1, s1, t1 = fold_block_params(params["conv1"], params["bn1"])
    wd2, bd2, wp2, s2, t2 = fold_block_params(params["conv2"], params["bn2"])
    Cmid = wp1.shape[0]
    Cout = wp2.shape[0]

    upm = jnp.asarray(_upsample_pad_matrix_np(h1, w1, H, W))   # (h1w1, HW)
    masks = jnp.asarray(_tap_masks_np(H, W))                   # (9, HW)

    x2f = x2.reshape(B, C2, HW)       # free, contiguous reshapes
    x1f = x1.reshape(B, C1, h1w1)

    const = lambda b: (0, 0)
    out = pl.pallas_call(
        functools.partial(_updsc_fused_kernel, W=W),
        out_shape=jax.ShapeDtypeStruct((B, Cout, HW), jnp.float32),
        grid=(B,),
        in_specs=[
            pl.BlockSpec((1, C2, HW), lambda b: (b, 0, 0)),
            pl.BlockSpec((1, C1, h1w1), lambda b: (b, 0, 0)),
            pl.BlockSpec((h1w1, HW), const),
            pl.BlockSpec((9, HW), const),
            pl.BlockSpec((Cin, 9), const),
            pl.BlockSpec((Cin, 1), const),
            pl.BlockSpec((Cmid, Cin), const),
            pl.BlockSpec((Cmid, 1), const),
            pl.BlockSpec((Cmid, 1), const),
            pl.BlockSpec((Cmid, 9), const),
            pl.BlockSpec((Cmid, 1), const),
            pl.BlockSpec((Cout, Cmid), const),
            pl.BlockSpec((Cout, 1), const),
            pl.BlockSpec((Cout, 1), const),
        ],
        out_specs=pl.BlockSpec((1, Cout, HW), lambda b: (b, 0, 0)),
        compiler_params=pltpu.CompilerParams(
            dimension_semantics=("parallel",)),
    )(x2f, x1f, upm, masks,
      wd1, bd1, wp1, s1, t1,
      wd2, bd2, wp2, s2, t2)

    return out.reshape(B, Cout, H, W)        # back to NCHW (free reshape)


# --------------------------------------------------------------------------
# Pure-JAX reference (lax.conv) for a correctness cross-check
# --------------------------------------------------------------------------
def bilinear_up2_align_corners(x_nchw):
    B, C, H, W = x_nchw.shape
    Mh = jnp.asarray(_interp_matrix_np(H, 2 * H))
    Mw = jnp.asarray(_interp_matrix_np(W, 2 * W))
    return jnp.einsum("oh,bchw,pw->bcop", Mh, x_nchw, Mw,
                      precision=lax.Precision.HIGHEST)


def _ref_block(x_nchw, conv_p, bn_p):
    cin = x_nchw.shape[1]
    y = lax.conv_general_dilated(
        x_nchw, conv_p["wd_pt"], (1, 1), ((1, 1), (1, 1)),
        dimension_numbers=("NCHW", "OIHW", "NCHW"), feature_group_count=cin,
        precision=lax.Precision.HIGHEST)
    y = y + conv_p["bd"][None, :, None, None]
    z = lax.conv_general_dilated(
        y, conv_p["wp_pt"], (1, 1), ((0, 0), (0, 0)),
        dimension_numbers=("NCHW", "OIHW", "NCHW"),
        precision=lax.Precision.HIGHEST)
    z = z + conv_p["bp"][None, :, None, None]
    z = ((z - bn_p["mean"][None, :, None, None])
         / jnp.sqrt(bn_p["var"][None, :, None, None] + BN_EPS)
         * bn_p["gamma"][None, :, None, None]
         + bn_p["beta"][None, :, None, None])
    return jnp.maximum(z, 0.0)


def ref_updsc(x1, x2, params):
    x1u = bilinear_up2_align_corners(x1)
    diffY = x2.shape[2] - x1u.shape[2]
    diffX = x2.shape[3] - x1u.shape[3]
    x1u = jnp.pad(x1u, ((0, 0), (0, 0),
                        (diffY // 2, diffY - diffY // 2),
                        (diffX // 2, diffX - diffX // 2)))
    x = jnp.concatenate([x2, x1u], axis=1)
    y = _ref_block(x, params["conv1"], params["bn1"])
    return _ref_block(y, params["conv2"], params["bn2"])


# --------------------------------------------------------------------------
if __name__ == "__main__":
    key = jax.random.PRNGKey(0)
    k_x1, k_x2, k_c1, k_c2, k_b1, k_b2 = jax.random.split(key, 6)

    # UpDSC(in_channels=8, out_channels=4, bilinear=True)
    in_channels, out_channels = 8, 4
    mid_channels = in_channels // 2

    # x1 (decoder feature, gets upsampled): (2, 4, 8, 8)
    # x2 (skip connection):                 (2, 4, 16, 16)
    x1 = jax.random.normal(k_x1, (2, in_channels // 2, 8, 8), jnp.float32)
    x2 = jax.random.normal(k_x2, (2, in_channels // 2, 16, 16), jnp.float32)

    params = dict(
        conv1=make_conv_dsc_params(k_c1, in_channels, mid_channels),
        bn1=make_bn_params(k_b1, mid_channels),
        conv2=make_conv_dsc_params(k_c2, mid_channels, out_channels),
        bn2=make_bn_params(k_b2, out_channels),
    )

    out = jax.jit(updsc_forward)(x1, x2, params)
    out = jax.block_until_ready(out)

    ref = jax.block_until_ready(ref_updsc(x1, x2, params))
    np.testing.assert_allclose(np.asarray(out), np.asarray(ref),
                               rtol=1e-3, atol=1e-3)

    assert out.shape == (2, out_channels, 16, 16)
    print("KERNEL_OK")
</pallas_src>

<mosaic_0001>
module attributes {stable_mosaic.version = 11 : i64} {
  func.func @_updsc_fused_kernel(%arg0: i32, %arg1: memref<1x4x256xf32, #tpu.memory_space<vmem>>, %arg2: memref<1x4x64xf32, #tpu.memory_space<vmem>>, %arg3: memref<64x256xf32, #tpu.memory_space<vmem>>, %arg4: memref<9x256xf32, #tpu.memory_space<vmem>>, %arg5: memref<8x9xf32, #tpu.memory_space<vmem>>, %arg6: memref<8x1xf32, #tpu.memory_space<vmem>>, %arg7: memref<4x8xf32, #tpu.memory_space<vmem>>, %arg8: memref<4x1xf32, #tpu.memory_space<vmem>>, %arg9: memref<4x1xf32, #tpu.memory_space<vmem>>, %arg10: memref<4x9xf32, #tpu.memory_space<vmem>>, %arg11: memref<4x1xf32, #tpu.memory_space<vmem>>, %arg12: memref<4x4xf32, #tpu.memory_space<vmem>>, %arg13: memref<4x1xf32, #tpu.memory_space<vmem>>, %arg14: memref<4x1xf32, #tpu.memory_space<vmem>>, %arg15: memref<1x4x256xf32, #tpu.memory_space<vmem>>) attributes {dimension_semantics = [#tpu.dimension_semantics<parallel>], iteration_bounds = array<i64: 2>, scalar_prefetch = 0 : i64, scratch_operands = 0 : i64, tpu.core_type = #tpu.core_type<tc>, window_params = [{transform_indices = @transform_0, window_bounds = array<i64: 1, 4, 256>}, {transform_indices = @transform_1, window_bounds = array<i64: 1, 4, 64>}, {pipeline_mode = #tpu.pipeline_mode<synchronous>, transform_indices = @transform_2, window_bounds = array<i64: 64, 256>}, {pipeline_mode = #tpu.pipeline_mode<synchronous>, transform_indices = @transform_3, window_bounds = array<i64: 9, 256>}, {pipeline_mode = #tpu.pipeline_mode<synchronous>, transform_indices = @transform_4, window_bounds = array<i64: 8, 9>}, {pipeline_mode = #tpu.pipeline_mode<synchronous>, transform_indices = @transform_5, window_bounds = array<i64: 8, 1>}, {pipeline_mode = #tpu.pipeline_mode<synchronous>, transform_indices = @transform_6, window_bounds = array<i64: 4, 8>}, {pipeline_mode = #tpu.pipeline_mode<synchronous>, transform_indices = @transform_7, window_bounds = array<i64: 4, 1>}, {pipeline_mode = #tpu.pipeline_mode<synchronous>, transform_indices = @transform_8, window_bounds = array<i64: 4, 1>}, {pipeline_mode = #tpu.pipeline_mode<synchronous>, transform_indices = @transform_9, window_bounds = array<i64: 4, 9>}, {pipeline_mode = #tpu.pipeline_mode<synchronous>, transform_indices = @transform_10, window_bounds = array<i64: 4, 1>}, {pipeline_mode = #tpu.pipeline_mode<synchronous>, transform_indices = @transform_11, window_bounds = array<i64: 4, 4>}, {pipeline_mode = #tpu.pipeline_mode<synchronous>, transform_indices = @transform_12, window_bounds = array<i64: 4, 1>}, {pipeline_mode = #tpu.pipeline_mode<synchronous>, transform_indices = @transform_13, window_bounds = array<i64: 4, 1>}, {transform_indices = @transform_14, window_bounds = array<i64: 1, 4, 256>}]} {
    %c0 = arith.constant 0 : index
    %c0_0 = arith.constant 0 : index
    %0 = vector.load %arg4[%c0, %c0_0] : memref<9x256xf32, #tpu.memory_space<vmem>>, vector<9x256xf32>
    %c0_1 = arith.constant 0 : index
    %c0_2 = arith.constant 0 : index
    %c0_3 = arith.constant 0 : index
    %1 = vector.load %arg2[%c0_1, %c0_2, %c0_3] : memref<1x4x64xf32, #tpu.memory_space<vmem>>, vector<1x4x64xf32>
    %2 = vector.shape_cast %1 : vector<1x4x64xf32> to vector<4x64xf32>
    %c0_4 = arith.constant 0 : index
    %c0_5 = arith.constant 0 : index
    %3 = vector.load %arg3[%c0_4, %c0_5] : memref<64x256xf32, #tpu.memory_space<vmem>>, vector<64x256xf32>
    %cst = arith.constant dense<0.000000e+00> : vector<4x256xf32>
    %4 = tpu.matmul %2, %3, %cst {dimension_numbers = #tpu.dot_dimension_numbers<[1], [0], [0], [1], [0, 0, 1, 1], [], []>} : vector<4x64xf32>, vector<64x256xf32>, vector<4x256xf32> -> vector<4x256xf32>
    %c0_6 = arith.constant 0 : index
    %c0_7 = arith.constant 0 : index
    %c0_8 = arith.constant 0 : index
    %5 = vector.load %arg1[%c0_6, %c0_7, %c0_8] : memref<1x4x256xf32, #tpu.memory_space<vmem>>, vector<1x4x256xf32>
    %6 = vector.shape_cast %5 : vector<1x4x256xf32> to vector<4x256xf32>
    %c0_9 = arith.constant 0 : index
    %c0_10 = arith.constant 0 : index
    %7 = vector.load %arg5[%c0_9, %c0_10] : memref<8x9xf32, #tpu.memory_space<vmem>>, vector<8x9xf32>
    %c0_11 = arith.constant 0 : index
    %c0_12 = arith.constant 0 : index
    %8 = vector.load %arg6[%c0_11, %c0_12] : memref<8x1xf32, #tpu.memory_space<vmem>>, vector<8x1xf32>
    %c0_13 = arith.constant 0 : index
    %c0_14 = arith.constant 0 : index
    %9 = vector.load %arg7[%c0_13, %c0_14] : memref<4x8xf32, #tpu.memory_space<vmem>>, vector<4x8xf32>
    %10 = vector.extract_strided_slice %7 {offsets = [0, 0], sizes = [4, 9], strides = [1, 1]} : vector<8x9xf32> to vector<4x9xf32>
    %11 = vector.extract_strided_slice %10 {offsets = [0, 4], sizes = [4, 1], strides = [1, 1]} : vector<4x9xf32> to vector<4x1xf32>
    %12 = vector.broadcast %11 : vector<4x1xf32> to vector<4x256xf32>
    %13 = arith.mulf %6, %12 : vector<4x256xf32>
    %c17_i32 = arith.constant 17 : i32
    %14 = tpu.dynamic_rotate %6 by %c17_i32 dim 1 : vector<4x256xf32>, i32 -> vector<4x256xf32>
    %15 = vector.extract_strided_slice %0 {offsets = [0, 0], sizes = [1, 256], strides = [1, 1]} : vector<9x256xf32> to vector<1x256xf32>
    %16 = vector.broadcast %15 : vector<1x256xf32> to vector<4x256xf32>
    %17 = arith.mulf %14, %16 : vector<4x256xf32>
    %18 = vector.extract_strided_slice %10 {offsets = [0, 0], sizes = [4, 1], strides = [1, 1]} : vector<4x9xf32> to vector<4x1xf32>
    %19 = vector.broadcast %18 : vector<4x1xf32> to vector<4x256xf32>
    %20 = arith.mulf %17, %19 : vector<4x256xf32>
    %21 = arith.addf %13, %20 : vector<4x256xf32>
    %c16_i32 = arith.constant 16 : i32
    %22 = tpu.dynamic_rotate %6 by %c16_i32 dim 1 : vector<4x256xf32>, i32 -> vector<4x256xf32>
    %23 = vector.extract_strided_slice %0 {offsets = [1, 0], sizes = [1, 256], strides = [1, 1]} : vector<9x256xf32> to vector<1x256xf32>
    %24 = vector.broadcast %23 : vector<1x256xf32> to vector<4x256xf32>
    %25 = arith.mulf %22, %24 : vector<4x256xf32>
    %26 = vector.extract_strided_slice %10 {offsets = [0, 1], sizes = [4, 1], strides = [1, 1]} : vector<4x9xf32> to vector<4x1xf32>
    %27 = vector.broadcast %26 : vector<4x1xf32> to vector<4x256xf32>
    %28 = arith.mulf %25, %27 : vector<4x256xf32>
    %29 = arith.addf %21, %28 : vector<4x256xf32>
    %c15_i32 = arith.constant 15 : i32
    %30 = tpu.dynamic_rotate %6 by %c15_i32 dim 1 : vector<4x256xf32>, i32 -> vector<4x256xf32>
    %31 = vector.extract_strided_slice %0 {offsets = [2, 0], sizes = [1, 256], strides = [1, 1]} : vector<9x256xf32> to vector<1x256xf32>
    %32 = vector.broadcast %31 : vector<1x256xf32> to vector<4x256xf32>
    %33 = arith.mulf %30, %32 : vector<4x256xf32>
    %34 = vector.extract_strided_slice %10 {offsets = [0, 2], sizes = [4, 1], strides = [1, 1]} : vector<4x9xf32> to vector<4x1xf32>
    %35 = vector.broadcast %34 : vector<4x1xf32> to vector<4x256xf32>
    %36 = arith.mulf %33, %35 : vector<4x256xf32>
    %37 = arith.addf %29, %36 : vector<4x256xf32>
    %c1_i32 = arith.constant 1 : i32
    %38 = tpu.dynamic_rotate %6 by %c1_i32 dim 1 : vector<4x256xf32>, i32 -> vector<4x256xf32>
    %39 = vector.extract_strided_slice %0 {offsets = [3, 0], sizes = [1, 256], strides = [1, 1]} : vector<9x256xf32> to vector<1x256xf32>
    %40 = vector.broadcast %39 : vector<1x256xf32> to vector<4x256xf32>
    %41 = arith.mulf %38, %40 : vector<4x256xf32>
    %42 = vector.extract_strided_slice %10 {offsets = [0, 3], sizes = [4, 1], strides = [1, 1]} : vector<4x9xf32> to vector<4x1xf32>
    %43 = vector.broadcast %42 : vector<4x1xf32> to vector<4x256xf32>
    %44 = arith.mulf %41, %43 : vector<4x256xf32>
    %45 = arith.addf %37, %44 : vector<4x256xf32>
    %c255_i32 = arith.constant 255 : i32
    %46 = tpu.dynamic_rotate %6 by %c255_i32 dim 1 : vector<4x256xf32>, i32 -> vector<4x256xf32>
    %47 = vector.extract_strided_slice %0 {offsets = [5, 0], sizes = [1, 256], strides = [1, 1]} : vector<9x256xf32> to vector<1x256xf32>
    %48 = vector.broadcast %47 : vector<1x256xf32> to vector<4x256xf32>
    %49 = arith.mulf %46, %48 : vector<4x256xf32>
    %50 = vector.extract_strided_slice %10 {offsets = [0, 5], sizes = [4, 1], strides = [1, 1]} : vector<4x9xf32> to vector<4x1xf32>
    %51 = vector.broadcast %50 : vector<4x1xf32> to vector<4x256xf32>
    %52 = arith.mulf %49, %51 : vector<4x256xf32>
    %53 = arith.addf %45, %52 : vector<4x256xf32>
    %c241_i32 = arith.constant 241 : i32
    %54 = tpu.dynamic_rotate %6 by %c241_i32 dim 1 : vector<4x256xf32>, i32 -> vector<4x256xf32>
    %55 = vector.extract_strided_slice %0 {offsets = [6, 0], sizes = [1, 256], strides = [1, 1]} : vector<9x256xf32> to vector<1x256xf32>
    %56 = vector.broadcast %55 : vector<1x256xf32> to vector<4x256xf32>
    %57 = arith.mulf %54, %56 : vector<4x256xf32>
    %58 = vector.extract_strided_slice %10 {offsets = [0, 6], sizes = [4, 1], strides = [1, 1]} : vector<4x9xf32> to vector<4x1xf32>
    %59 = vector.broadcast %58 : vector<4x1xf32> to vector<4x256xf32>
    %60 = arith.mulf %57, %59 : vector<4x256xf32>
    %61 = arith.addf %53, %60 : vector<4x256xf32>
    %c240_i32 = arith.constant 240 : i32
    %62 = tpu.dynamic_rotate %6 by %c240_i32 dim 1 : vector<4x256xf32>, i32 -> vector<4x256xf32>
    %63 = vector.extract_strided_slice %0 {offsets = [7, 0], sizes = [1, 256], strides = [1, 1]} : vector<9x256xf32> to vector<1x256xf32>
    %64 = vector.broadcast %63 : vector<1x256xf32> to vector<4x256xf32>
    %65 = arith.mulf %62, %64 : vector<4x256xf32>
    %66 = vector.extract_strided_slice %10 {offsets = [0, 7], sizes = [4, 1], strides = [1, 1]} : vector<4x9xf32> to vector<4x1xf32>
    %67 = vector.broadcast %66 : vector<4x1xf32> to vector<4x256xf32>
    %68 = arith.mulf %65, %67 : vector<4x256xf32>
    %69 = arith.addf %61, %68 : vector<4x256xf32>
    %c239_i32 = arith.constant 239 : i32
    %70 = tpu.dynamic_rotate %6 by %c239_i32 dim 1 : vector<4x256xf32>, i32 -> vector<4x256xf32>
    %71 = vector.extract_strided_slice %0 {offsets = [8, 0], sizes = [1, 256], strides = [1, 1]} : vector<9x256xf32> to vector<1x256xf32>
    %72 = vector.broadcast %71 : vector<1x256xf32> to vector<4x256xf32>
    %73 = arith.mulf %70, %72 : vector<4x256xf32>
    %74 = vector.extract_strided_slice %10 {offsets = [0, 8], sizes = [4, 1], strides = [1, 1]} : vector<4x9xf32> to vector<4x1xf32>
    %75 = vector.broadcast %74 : vector<4x1xf32> to vector<4x256xf32>
    %76 = arith.mulf %73, %75 : vector<4x256xf32>
    %77 = arith.addf %69, %76 : vector<4x256xf32>
    %78 = vector.extract_strided_slice %8 {offsets = [0, 0], sizes = [4, 1], strides = [1, 1]} : vector<8x1xf32> to vector<4x1xf32>
    %79 = vector.broadcast %78 : vector<4x1xf32> to vector<4x256xf32>
    %80 = arith.addf %77, %79 : vector<4x256xf32>
    %81 = vector.extract_strided_slice %7 {offsets = [4, 0], sizes = [4, 9], strides = [1, 1]} : vector<8x9xf32> to vector<4x9xf32>
    %82 = vector.extract_strided_slice %81 {offsets = [0, 4], sizes = [4, 1], strides = [1, 1]} : vector<4x9xf32> to vector<4x1xf32>
    %83 = vector.broadcast %82 : vector<4x1xf32> to vector<4x256xf32>
    %84 = arith.mulf %4, %83 : vector<4x256xf32>
    %c17_i32_15 = arith.constant 17 : i32
    %85 = tpu.dynamic_rotate %4 by %c17_i32_15 dim 1 : vector<4x256xf32>, i32 -> vector<4x256xf32>
    %86 = vector.extract_strided_slice %0 {offsets = [0, 0], sizes = [1, 256], strides = [1, 1]} : vector<9x256xf32> to vector<1x256xf32>
    %87 = vector.broadcast %86 : vector<1x256xf32> to vector<4x256xf32>
    %88 = arith.mulf %85, %87 : vector<4x256xf32>
    %89 = vector.extract_strided_slice %81 {offsets = [0, 0], sizes = [4, 1], strides = [1, 1]} : vector<4x9xf32> to vector<4x1xf32>
    %90 = vector.broadcast %89 : vector<4x1xf32> to vector<4x256xf32>
    %91 = arith.mulf %88, %90 : vector<4x256xf32>
    %92 = arith.addf %84, %91 : vector<4x256xf32>
    %c16_i32_16 = arith.constant 16 : i32
    %93 = tpu.dynamic_rotate %4 by %c16_i32_16 dim 1 : vector<4x256xf32>, i32 -> vector<4x256xf32>
    %94 = vector.extract_strided_slice %0 {offsets = [1, 0], sizes = [1, 256], strides = [1, 1]} : vector<9x256xf32> to vector<1x256xf32>
    %95 = vector.broadcast %94 : vector<1x256xf32> to vector<4x256xf32>
    %96 = arith.mulf %93, %95 : vector<4x256xf32>
    %97 = vector.extract_strided_slice %81 {offsets = [0, 1], sizes = [4, 1], strides = [1, 1]} : vector<4x9xf32> to vector<4x1xf32>
    %98 = vector.broadcast %97 : vector<4x1xf32> to vector<4x256xf32>
    %99 = arith.mulf %96, %98 : vector<4x256xf32>
    %100 = arith.addf %92, %99 : vector<4x256xf32>
    %c15_i32_17 = arith.constant 15 : i32
    %101 = tpu.dynamic_rotate %4 by %c15_i32_17 dim 1 : vector<4x256xf32>, i32 -> vector<4x256xf32>
    %102 = vector.extract_strided_slice %0 {offsets = [2, 0], sizes = [1, 256], strides = [1, 1]} : vector<9x256xf32> to vector<1x256xf32>
    %103 = vector.broadcast %102 : vector<1x256xf32> to vector<4x256xf32>
    %104 = arith.mulf %101, %103 : vector<4x256xf32>
    %105 = vector.extract_strided_slice %81 {offsets = [0, 2], sizes = [4, 1], strides = [1, 1]} : vector<4x9xf32> to vector<4x1xf32>
    %106 = vector.broadcast %105 : vector<4x1xf32> to vector<4x256xf32>
    %107 = arith.mulf %104, %106 : vector<4x256xf32>
    %108 = arith.addf %100, %107 : vector<4x256xf32>
    %c1_i32_18 = arith.constant 1 : i32
    %109 = tpu.dynamic_rotate %4 by %c1_i32_18 dim 1 : vector<4x256xf32>, i32 -> vector<4x256xf32>
    %110 = vector.extract_strided_slice %0 {offsets = [3, 0], sizes = [1, 256], strides = [1, 1]} : vector<9x256xf32> to vector<1x256xf32>
    %111 = vector.broadcast %110 : vector<1x256xf32> to vector<4x256xf32>
    %112 = arith.mulf %109, %111 : vector<4x256xf32>
    %113 = vector.extract_strided_slice %81 {offsets = [0, 3], sizes = [4, 1], strides = [1, 1]} : vector<4x9xf32> to vector<4x1xf32>
    %114 = vector.broadcast %113 : vector<4x1xf32> to vector<4x256xf32>
    %115 = arith.mulf %112, %114 : vector<4x256xf32>
    %116 = arith.addf %108, %115 : vector<4x256xf32>
    %c255_i32_19 = arith.constant 255 : i32
    %117 = tpu.dynamic_rotate %4 by %c255_i32_19 dim 1 : vector<4x256xf32>, i32 -> vector<4x256xf32>
    %118 = vector.extract_strided_slice %0 {offsets = [5, 0], sizes = [1, 256], strides = [1, 1]} : vector<9x256xf32> to vector<1x256xf32>
    %119 = vector.broadcast %118 : vector<1x256xf32> to vector<4x256xf32>
    %120 = arith.mulf %117, %119 : vector<4x256xf32>
    %121 = vector.extract_strided_slice %81 {offsets = [0, 5], sizes = [4, 1], strides = [1, 1]} : vector<4x9xf32> to vector<4x1xf32>
    %122 = vector.broadcast %121 : vector<4x1xf32> to vector<4x256xf32>
    %123 = arith.mulf %120, %122 : vector<4x256xf32>
    %124 = arith.addf %116, %123 : vector<4x256xf32>
    %c241_i32_20 = arith.constant 241 : i32
    %125 = tpu.dynamic_rotate %4 by %c241_i32_20 dim 1 : vector<4x256xf32>, i32 -> vector<4x256xf32>
    %126 = vector.extract_strided_slice %0 {offsets = [6, 0], sizes = [1, 256], strides = [1, 1]} : vector<9x256xf32> to vector<1x256xf32>
    %127 = vector.broadcast %126 : vector<1x256xf32> to vector<4x256xf32>
    %128 = arith.mulf %125, %127 : vector<4x256xf32>
    %129 = vector.extract_strided_slice %81 {offsets = [0, 6], sizes = [4, 1], strides = [1, 1]} : vector<4x9xf32> to vector<4x1xf32>
    %130 = vector.broadcast %129 : vector<4x1xf32> to vector<4x256xf32>
    %131 = arith.mulf %128, %130 : vector<4x256xf32>
    %132 = arith.addf %124, %131 : vector<4x256xf32>
    %c240_i32_21 = arith.constant 240 : i32
    %133 = tpu.dynamic_rotate %4 by %c240_i32_21 dim 1 : vector<4x256xf32>, i32 -> vector<4x256xf32>
    %134 = vector.extract_strided_slice %0 {offsets = [7, 0], sizes = [1, 256], strides = [1, 1]} : vector<9x256xf32> to vector<1x256xf32>
    %135 = vector.broadcast %134 : vector<1x256xf32> to vector<4x256xf32>
    %136 = arith.mulf %133, %135 : vector<4x256xf32>
    %137 = vector.extract_strided_slice %81 {offsets = [0, 7], sizes = [4, 1], strides = [1, 1]} : vector<4x9xf32> to vector<4x1xf32>
    %138 = vector.broadcast %137 : vector<4x1xf32> to vector<4x256xf32>
    %139 = arith.mulf %136, %138 : vector<4x256xf32>
    %140 = arith.addf %132, %139 : vector<4x256xf32>
    %c239_i32_22 = arith.constant 239 : i32
    %141 = tpu.dynamic_rotate %4 by %c239_i32_22 dim 1 : vector<4x256xf32>, i32 -> vector<4x256xf32>
    %142 = vector.extract_strided_slice %0 {offsets = [8, 0], sizes = [1, 256], strides = [1, 1]} : vector<9x256xf32> to vector<1x256xf32>
    %143 = vector.broadcast %142 : vector<1x256xf32> to vector<4x256xf32>
    %144 = arith.mulf %141, %143 : vector<4x256xf32>
    %145 = vector.extract_strided_slice %81 {offsets = [0, 8], sizes = [4, 1], strides = [1, 1]} : vector<4x9xf32> to vector<4x1xf32>
    %146 = vector.broadcast %145 : vector<4x1xf32> to vector<4x256xf32>
    %147 = arith.mulf %144, %146 : vector<4x256xf32>
    %148 = arith.addf %140, %147 : vector<4x256xf32>
    %149 = vector.extract_strided_slice %8 {offsets = [4, 0], sizes = [4, 1], strides = [1, 1]} : vector<8x1xf32> to vector<4x1xf32>
    %150 = vector.broadcast %149 : vector<4x1xf32> to vector<4x256xf32>
    %151 = arith.addf %148, %150 : vector<4x256xf32>
    %152 = vector.extract_strided_slice %9 {offsets = [0, 0], sizes = [4, 4], strides = [1, 1]} : vector<4x8xf32> to vector<4x4xf32>
    %cst_23 = arith.constant dense<0.000000e+00> : vector<4x256xf32>
    %153 = tpu.matmul %152, %80, %cst_23 {dimension_numbers = #tpu.dot_dimension_numbers<[1], [0], [0], [1], [0, 0, 1, 1], [], []>} : vector<4x4xf32>, vector<4x256xf32>, vector<4x256xf32> -> vector<4x256xf32>
    %154 = vector.extract_strided_slice %9 {offsets = [0, 4], sizes = [4, 4], strides = [1, 1]} : vector<4x8xf32> to vector<4x4xf32>
    %cst_24 = arith.constant dense<0.000000e+00> : vector<4x256xf32>
    %155 = tpu.matmul %154, %151, %cst_24 {dimension_numbers = #tpu.dot_dimension_numbers<[1], [0], [0], [1], [0, 0, 1, 1], [], []>} : vector<4x4xf32>, vector<4x256xf32>, vector<4x256xf32> -> vector<4x256xf32>
    %156 = arith.addf %153, %155 : vector<4x256xf32>
    %c0_25 = arith.constant 0 : index
    %c0_26 = arith.constant 0 : index
    %157 = vector.load %arg8[%c0_25, %c0_26] : memref<4x1xf32, #tpu.memory_space<vmem>>, vector<4x1xf32>
    %158 = vector.broadcast %157 : vector<4x1xf32> to vector<4x256xf32>
    %159 = arith.mulf %156, %158 : vector<4x256xf32>
    %c0_27 = arith.constant 0 : index
    %c0_28 = arith.constant 0 : index
    %160 = vector.load %arg9[%c0_27, %c0_28] : memref<4x1xf32, #tpu.memory_space<vmem>>, vector<4x1xf32>
    %161 = vector.broadcast %160 : vector<4x1xf32> to vector<4x256xf32>
    %162 = arith.addf %159, %161 : vector<4x256xf32>
    %cst_29 = arith.constant 0.000000e+00 : f32
    %163 = vector.broadcast %cst_29 : f32 to vector<4x256xf32>
    %164 = arith.maximumf %162, %163 : vector<4x256xf32>
    %c0_30 = arith.constant 0 : index
    %c0_31 = arith.constant 0 : index
    %165 = vector.load %arg10[%c0_30, %c0_31] : memref<4x9xf32, #tpu.memory_space<vmem>>, vector<4x9xf32>
    %166 = vector.extract_strided_slice %165 {offsets = [0, 4], sizes = [4, 1], strides = [1, 1]} : vector<4x9xf32> to vector<4x1xf32>
    %167 = vector.broadcast %166 : vector<4x1xf32> to vector<4x256xf32>
    %168 = arith.mulf %164, %167 : vector<4x256xf32>
    %c17_i32_32 = arith.constant 17 : i32
    %169 = tpu.dynamic_rotate %164 by %c17_i32_32 dim 1 : vector<4x256xf32>, i32 -> vector<4x256xf32>
    %170 = vector.extract_strided_slice %0 {offsets = [0, 0], sizes = [1, 256], strides = [1, 1]} : vector<9x256xf32> to vector<1x256xf32>
    %171 = vector.broadcast %170 : vector<1x256xf32> to vector<4x256xf32>
    %172 = arith.mulf %169, %171 : vector<4x256xf32>
    %173 = vector.extract_strided_slice %165 {offsets = [0, 0], sizes = [4, 1], strides = [1, 1]} : vector<4x9xf32> to vector<4x1xf32>
    %174 = vector.broadcast %173 : vector<4x1xf32> to vector<4x256xf32>
    %175 = arith.mulf %172, %174 : vector<4x256xf32>
    %176 = arith.addf %168, %175 : vector<4x256xf32>
    %c16_i32_33 = arith.constant 16 : i32
    %177 = tpu.dynamic_rotate %164 by %c16_i32_33 dim 1 : vector<4x256xf32>, i32 -> vector<4x256xf32>
    %178 = vector.extract_strided_slice %0 {offsets = [1, 0], sizes = [1, 256], strides = [1, 1]} : vector<9x256xf32> to vector<1x256xf32>
    %179 = vector.broadcast %178 : vector<1x256xf32> to vector<4x256xf32>
    %180 = arith.mulf %177, %179 : vector<4x256xf32>
    %181 = vector.extract_strided_slice %165 {offsets = [0, 1], sizes = [4, 1], strides = [1, 1]} : vector<4x9xf32> to vector<4x1xf32>
    %182 = vector.broadcast %181 : vector<4x1xf32> to vector<4x256xf32>
    %183 = arith.mulf %180, %182 : vector<4x256xf32>
    %184 = arith.addf %176, %183 : vector<4x256xf32>
    %c15_i32_34 = arith.constant 15 : i32
    %185 = tpu.dynamic_rotate %164 by %c15_i32_34 dim 1 : vector<4x256xf32>, i32 -> vector<4x256xf32>
    %186 = vector.extract_strided_slice %0 {offsets = [2, 0], sizes = [1, 256], strides = [1, 1]} : vector<9x256xf32> to vector<1x256xf32>
    %187 = vector.broadcast %186 : vector<1x256xf32> to vector<4x256xf32>
    %188 = arith.mulf %185, %187 : vector<4x256xf32>
    %189 = vector.extract_strided_slice %165 {offsets = [0, 2], sizes = [4, 1], strides = [1, 1]} : vector<4x9xf32> to vector<4x1xf32>
    %190 = vector.broadcast %189 : vector<4x1xf32> to vector<4x256xf32>
    %191 = arith.mulf %188, %190 : vector<4x256xf32>
    %192 = arith.addf %184, %191 : vector<4x256xf32>
    %c1_i32_35 = arith.constant 1 : i32
    %193 = tpu.dynamic_rotate %164 by %c1_i32_35 dim 1 : vector<4x256xf32>, i32 -> vector<4x256xf32>
    %194 = vector.extract_strided_slice %0 {offsets = [3, 0], sizes = [1, 256], strides = [1, 1]} : vector<9x256xf32> to vector<1x256xf32>
    %195 = vector.broadcast %194 : vector<1x256xf32> to vector<4x256xf32>
    %196 = arith.mulf %193, %195 : vector<4x256xf32>
    %197 = vector.extract_strided_slice %165 {offsets = [0, 3], sizes = [4, 1], strides = [1, 1]} : vector<4x9xf32> to vector<4x1xf32>
    %198 = vector.broadcast %197 : vector<4x1xf32> to vector<4x256xf32>
    %199 = arith.mulf %196, %198 : vector<4x256xf32>
    %200 = arith.addf %192, %199 : vector<4x256xf32>
    %c255_i32_36 = arith.constant 255 : i32
    %201 = tpu.dynamic_rotate %164 by %c255_i32_36 dim 1 : vector<4x256xf32>, i32 -> vector<4x256xf32>
    %202 = vector.extract_strided_slice %0 {offsets = [5, 0], sizes = [1, 256], strides = [1, 1]} : vector<9x256xf32> to vector<1x256xf32>
    %203 = vector.broadcast %202 : vector<1x256xf32> to vector<4x256xf32>
    %204 = arith.mulf %201, %203 : vector<4x256xf32>
    %205 = vector.extract_strided_slice %165 {offsets = [0, 5], sizes = [4, 1], strides = [1, 1]} : vector<4x9xf32> to vector<4x1xf32>
    %206 = vector.broadcast %205 : vector<4x1xf32> to vector<4x256xf32>
    %207 = arith.mulf %204, %206 : vector<4x256xf32>
    %208 = arith.addf %200, %207 : vector<4x256xf32>
    %c241_i32_37 = arith.constant 241 : i32
    %209 = tpu.dynamic_rotate %164 by %c241_i32_37 dim 1 : vector<4x256xf32>, i32 -> vector<4x256xf32>
    %210 = vector.extract_strided_slice %0 {offsets = [6, 0], sizes = [1, 256], strides = [1, 1]} : vector<9x256xf32> to vector<1x256xf32>
    %211 = vector.broadcast %210 : vector<1x256xf32> to vector<4x256xf32>
    %212 = arith.mulf %209, %211 : vector<4x256xf32>
    %213 = vector.extract_strided_slice %165 {offsets = [0, 6], sizes = [4, 1], strides = [1, 1]} : vector<4x9xf32> to vector<4x1xf32>
    %214 = vector.broadcast %213 : vector<4x1xf32> to vector<4x256xf32>
    %215 = arith.mulf %212, %214 : vector<4x256xf32>
    %216 = arith.addf %208, %215 : vector<4x256xf32>
    %c240_i32_38 = arith.constant 240 : i32
    %217 = tpu.dynamic_rotate %164 by %c240_i32_38 dim 1 : vector<4x256xf32>, i32 -> vector<4x256xf32>
    %218 = vector.extract_strided_slice %0 {offsets = [7, 0], sizes = [1, 256], strides = [1, 1]} : vector<9x256xf32> to vector<1x256xf32>
    %219 = vector.broadcast %218 : vector<1x256xf32> to vector<4x256xf32>
    %220 = arith.mulf %217, %219 : vector<4x256xf32>
    %221 = vector.extract_strided_slice %165 {offsets = [0, 7], sizes = [4, 1], strides = [1, 1]} : vector<4x9xf32> to vector<4x1xf32>
    %222 = vector.broadcast %221 : vector<4x1xf32> to vector<4x256xf32>
    %223 = arith.mulf %220, %222 : vector<4x256xf32>
    %224 = arith.addf %216, %223 : vector<4x256xf32>
    %c239_i32_39 = arith.constant 239 : i32
    %225 = tpu.dynamic_rotate %164 by %c239_i32_39 dim 1 : vector<4x256xf32>, i32 -> vector<4x256xf32>
    %226 = vector.extract_strided_slice %0 {offsets = [8, 0], sizes = [1, 256], strides = [1, 1]} : vector<9x256xf32> to vector<1x256xf32>
    %227 = vector.broadcast %226 : vector<1x256xf32> to vector<4x256xf32>
    %228 = arith.mulf %225, %227 : vector<4x256xf32>
    %229 = vector.extract_strided_slice %165 {offsets = [0, 8], sizes = [4, 1], strides = [1, 1]} : vector<4x9xf32> to vector<4x1xf32>
    %230 = vector.broadcast %229 : vector<4x1xf32> to vector<4x256xf32>
    %231 = arith.mulf %228, %230 : vector<4x256xf32>
    %232 = arith.addf %224, %231 : vector<4x256xf32>
    %c0_40 = arith.constant 0 : index
    %c0_41 = arith.constant 0 : index
    %233 = vector.load %arg11[%c0_40, %c0_41] : memref<4x1xf32, #tpu.memory_space<vmem>>, vector<4x1xf32>
    %234 = vector.broadcast %233 : vector<4x1xf32> to vector<4x256xf32>
    %235 = arith.addf %232, %234 : vector<4x256xf32>
    %c0_42 = arith.constant 0 : index
    %c0_43 = arith.constant 0 : index
    %236 = vector.load %arg12[%c0_42, %c0_43] : memref<4x4xf32, #tpu.memory_space<vmem>>, vector<4x4xf32>
    %cst_44 = arith.constant dense<0.000000e+00> : vector<4x256xf32>
    %237 = tpu.matmul %236, %235, %cst_44 {dimension_numbers = #tpu.dot_dimension_numbers<[1], [0], [0], [1], [0, 0, 1, 1], [], []>} : vector<4x4xf32>, vector<4x256xf32>, vector<4x256xf32> -> vector<4x256xf32>
    %c0_45 = arith.constant 0 : index
    %c0_46 = arith.constant 0 : index
    %238 = vector.load %arg13[%c0_45, %c0_46] : memref<4x1xf32, #tpu.memory_space<vmem>>, vector<4x1xf32>
    %239 = vector.broadcast %238 : vector<4x1xf32> to vector<4x256xf32>
    %240 = arith.mulf %237, %239 : vector<4x256xf32>
    %c0_47 = arith.constant 0 : index
    %c0_48 = arith.constant 0 : index
    %241 = vector.load %arg14[%c0_47, %c0_48] : memref<4x1xf32, #tpu.memory_space<vmem>>, vector<4x1xf32>
    %242 = vector.broadcast %241 : vector<4x1xf32> to vector<4x256xf32>
    %243 = arith.addf %240, %242 : vector<4x256xf32>
    %cst_49 = arith.constant 0.000000e+00 : f32
    %244 = vector.broadcast %cst_49 : f32 to vector<4x256xf32>
    %245 = arith.maximumf %243, %244 : vector<4x256xf32>
    %c0_50 = arith.constant 0 : index
    %c0_51 = arith.constant 0 : index
    %c0_52 = arith.constant 0 : index
    %246 = vector.load %arg15[%c0_50, %c0_51, %c0_52] : memref<1x4x256xf32, #tpu.memory_space<vmem>>, vector<1x4x256xf32>
    %247 = vector.shape_cast %246 : vector<1x4x256xf32> to vector<4x256xf32>
    %248 = vector.shape_cast %245 : vector<4x256xf32> to vector<1x4x256xf32>
    tpu.vector_store %arg15[%c0_50, %c0_51, %c0_52], %248 {strides = array<i32>} : memref<1x4x256xf32, #tpu.memory_space<vmem>>, vector<1x4x256xf32>,
    return
  }
  func.func @transform_0(%arg0: i32) -> (i32, i32, i32) {
    %c0_i32 = arith.constant 0 : i32
    %c0_i32_0 = arith.constant 0 : i32
    %c0_i32_1 = arith.constant 0 : i32
    return %arg0, %c0_i32, %c0_i32_0 : i32, i32, i32
  }
  func.func @transform_1(%arg0: i32) -> (i32, i32, i32) {
    %c0_i32 = arith.constant 0 : i32
    %c0_i32_0 = arith.constant 0 : i32
    %c0_i32_1 = arith.constant 0 : i32
    return %arg0, %c0_i32, %c0_i32_0 : i32, i32, i32
  }
  func.func @transform_2(%arg0: i32) -> (i32, i32) {
    %c0_i32 = arith.constant 0 : i32
    %c0_i32_0 = arith.constant 0 : i32
    %c0_i32_1 = arith.constant 0 : i32
    return %c0_i32, %c0_i32_0 : i32, i32
  }
  func.func @transform_3(%arg0: i32) -> (i32, i32) {
    %c0_i32 = arith.constant 0 : i32
    %c0_i32_0 = arith.constant 0 : i32
    %c0_i32_1 = arith.constant 0 : i32
    return %c0_i32, %c0_i32_0 : i32, i32
  }
  func.func @transform_4(%arg0: i32) -> (i32, i32) {
    %c0_i32 = arith.constant 0 : i32
    %c0_i32_0 = arith.constant 0 : i32
    %c0_i32_1 = arith.constant 0 : i32
    return %c0_i32, %c0_i32_0 : i32, i32
  }
  func.func @transform_5(%arg0: i32) -> (i32, i32) {
    %c0_i32 = arith.constant 0 : i32
    %c0_i32_0 = arith.constant 0 : i32
    %c0_i32_1 = arith.constant 0 : i32
    return %c0_i32, %c0_i32_0 : i32, i32
  }
  func.func @transform_6(%arg0: i32) -> (i32, i32) {
    %c0_i32 = arith.constant 0 : i32
    %c0_i32_0 = arith.constant 0 : i32
    %c0_i32_1 = arith.constant 0 : i32
    return %c0_i32, %c0_i32_0 : i32, i32
  }
  func.func @transform_7(%arg0: i32) -> (i32, i32) {
    %c0_i32 = arith.constant 0 : i32
    %c0_i32_0 = arith.constant 0 : i32
    %c0_i32_1 = arith.constant 0 : i32
    return %c0_i32, %c0_i32_0 : i32, i32
  }
  func.func @transform_8(%arg0: i32) -> (i32, i32) {
    %c0_i32 = arith.constant 0 : i32
    %c0_i32_0 = arith.constant 0 : i32
    %c0_i32_1 = arith.constant 0 : i32
    return %c0_i32, %c0_i32_0 : i32, i32
  }
  func.func @transform_9(%arg0: i32) -> (i32, i32) {
    %c0_i32 = arith.constant 0 : i32
    %c0_i32_0 = arith.constant 0 : i32
    %c0_i32_1 = arith.constant 0 : i32
    return %c0_i32, %c0_i32_0 : i32, i32
  }
  func.func @transform_10(%arg0: i32) -> (i32, i32) {
    %c0_i32 = arith.constant 0 : i32
    %c0_i32_0 = arith.constant 0 : i32
    %c0_i32_1 = arith.constant 0 : i32
    return %c0_i32, %c0_i32_0 : i32, i32
  }
  func.func @transform_11(%arg0: i32) -> (i32, i32) {
    %c0_i32 = arith.constant 0 : i32
    %c0_i32_0 = arith.constant 0 : i32
    %c0_i32_1 = arith.constant 0 : i32
    return %c0_i32, %c0_i32_0 : i32, i32
  }
  func.func @transform_12(%arg0: i32) -> (i32, i32) {
    %c0_i32 = arith.constant 0 : i32
    %c0_i32_0 = arith.constant 0 : i32
    %c0_i32_1 = arith.constant 0 : i32
    return %c0_i32, %c0_i32_0 : i32, i32
  }
  func.func @transform_13(%arg0: i32) -> (i32, i32) {
    %c0_i32 = arith.constant 0 : i32
    %c0_i32_0 = arith.constant 0 : i32
    %c0_i32_1 = arith.constant 0 : i32
    return %c0_i32, %c0_i32_0 : i32, i32
  }
  func.func @transform_14(%arg0: i32) -> (i32, i32, i32) {
    %c0_i32 = arith.constant 0 : i32
    %c0_i32_0 = arith.constant 0 : i32
    %c0_i32_1 = arith.constant 0 : i32
    return %arg0, %c0_i32, %c0_i32_0 : i32, i32, i32
  }
}

</mosaic_0001>

<bundles_post_ra>
// kernel: squeeze.4
= control target key start
LH: loop header
LB: loop body
LE: loop exit
PB: predicated region body
PF: predicated region fallthrough
CT: control target
= control target key end

     0   :  { %vm15_vm0 = vcmask 64512   ;;  %s59_s0 = inlined_call_operand.vmem [shape: f32[8,3,3], index: 0, kind: input, shape index: {}]   ;;  %s60_s1 = inlined_call_operand.vmem [shape: f32[8,9], index: 1, kind: output, shape index: {}]  }
   0x1   :  { %v27_v0 = vld [vmem:[%s59_s0 + $0x8] sm:$0xf]  ;;  %v28_v1 = vld [vmem:[%s59_s0 + $0x4] sm:$0xf]  ;;  %v12_v2 = vld [vmem:[%s59_s0] sm:$0xf] }
   0x2   :  { %7 = vst [vmem:[#allocation0] sm:$0xf] %v27_v0 }
   0x3   :  { %11 = vst [vmem:[#allocation0 + $0x10] sm:$0xf] %v28_v1 }
   0x4   :  { %13 = vst [vmem:[#allocation0 + $0x8] sm:$0xf] %v12_v2 }
   0x9   :  { %v23_v3 = vld [vmem:[#allocation0] sm:$0x7]  }
   0xa   :  { %v18_v4 = vld [vmem:[#allocation0 + $0x10] sm:$0x7]   ;;  %30 = vst.msk [vmem:[%s60_s1 + $0x6] sm:$0x7] %vm15_vm0, %v23_v3  }
   0xb   :  { %v14_v5 = vld [vmem:[#allocation0 + $0x8] sm:$0x7]   ;;  %29 = vst.msk [vmem:[%s60_s1 + $0x3] sm:$0x7] %vm15_vm0, %v18_v4  }
   0xc   :  { %16 = vst.msk [vmem:[%s60_s1] sm:$0x7] %vm15_vm0, %v14_v5  }

// kernel: updsc_forward.1
= control target key start
LH: loop header
LB: loop body
LE: loop exit
PB: predicated region body
PF: predicated region fallthrough
CT: control target
= control target key end

     0   :  { %s1508_s29 = smov 0   ;;  %s2048_s0 = inlined_call_operand.vmem [shape: f32[2,4,256], index: 0, kind: input, shape index: {}]   ;;  %s2049_s1 = inlined_call_operand.vmem [shape: f32[2,4,64], index: 1, kind: input, shape index: {}]   ;;  %s2050_s2 = inlined_call_operand.vmem [shape: f32[64,256], index: 2, kind: input, shape index: {}]   ;;  %s2051_s3 = inlined_call_operand.vmem [shape: f32[9,256], index: 3, kind: input, shape index: {}]   ;;  %s2052_s4 = inlined_call_operand.vmem [shape: f32[8,9], index: 4, kind: input, shape index: {}]   ;;  %s2053_s5 = inlined_call_operand.vmem [shape: f32[8,1], index: 5, kind: input, shape index: {}]   ;;  %s2054_s6 = inlined_call_operand.vmem [shape: f32[4,8], index: 6, kind: input, shape index: {}]   ;;  %s2055_s7 = inlined_call_operand.vmem [shape: f32[4,1], index: 7, kind: input, shape index: {}]   ;;  %s2056_s8 = inlined_call_operand.vmem [shape: f32[4,1], index: 8, kind: input, shape index: {}]   ;;  %s2057_s9 = inlined_call_operand.vmem [shape: f32[4,9], index: 9, kind: input, shape index: {}]   ;;  %s2058_s10 = inlined_call_operand.vmem [shape: f32[4,1], index: 10, kind: input, shape index: {}]   ;;  %s2059_s11 = inlined_call_operand.vmem [shape: f32[4,4], index: 11, kind: input, shape index: {}]   ;;  %s2060_s12 = inlined_call_operand.vmem [shape: f32[4,1], index: 12, kind: input, shape index: {}]   ;;  %s2061_s13 = inlined_call_operand.vmem [shape: f32[4,1], index: 13, kind: input, shape index: {}]   ;;  %s2062_s14 = inlined_call_operand.vmem [shape: f32[2,4,256], index: 14, kind: output, shape index: {}]  }
   0x1 LB: > { %s1327_s30 = sadd.s32 4294967295, %s1412_s29   ;;  %p1331_p0 = scmp.ge.s32.totalorder %s1412_s29, 1  ;;  %s1412_s29 = sphi %s1508_s29, %s24_s29  }
   0x2   : > { %p421_p1 = scmp.lt.s32.totalorder %s1412_s29, 3 }
   0x4   : > { %p422_p2 = pnand %p1331_p0, %p421_p1 }
   0x5   : > { %p471_p3 = scmp.lt.s32.totalorder (!%p422_p2), %s1327_s30, 1  ;;  %s1419_s18 = smov (!%p422_p2), 16  }
   0x6   : > { %425 = sbr.rel (%p422_p2) target bundleno = 782 (0x30e), region = 76  ;;  %s1420_s19 = smov (!%p422_p2), 15  }
   0x7   : > { %s1421_s20 = smov (!%p422_p2), 1   ;;  %s1422_s21 = smov (!%p422_p2), 127  }
   0x8   : > { %s1427_s23 = smov (!%p422_p2), 112   ;;  %s1429_s24 = smov (!%p422_p2), 111  }
   0x9   : > { %s1432_s26 = smov (!%p422_p2), 124  }
   0xb   : > { %v504_v0 = vld [vmem:[%s2050_s2 + $0x70] sm:$0xff]  ;;  %v505_v1 = vld [vmem:[%s2050_s2 + $0x78] sm:$0xff]  ;;  %v502_v2 = vld [vmem:[%s2050_s2 + $0x60] sm:$0xff]  ;;  %s2066_s30 = smov (!%p471_p3, %s1327_s30), 1  ;;  %v1414_v6 = vmov 4   ;;  %v1415_v7 = vmov 2   ;;  %v574_v45 = vlaneseq }
   0xc   : > { %518 = vmatpush.msra.mxu0 %v504_v0  ;;  %538 = vmatpush.msra.mxu1 %v505_v1  ;;  %v503_v3 = vld [vmem:[%s2050_s2 + $0x68] sm:$0xff]  ;;  %v500_v4 = vld [vmem:[%s2050_s2 + $0x50] sm:$0xff]  ;;  %v501_v5 = vld [vmem:[%s2050_s2 + $0x58] sm:$0xff]  ;;  %s2063_s17 = sshll.u32 %s2066_s30, 3  ;;  %s1334_s27 = sshll.u32 %s2066_s30, 2  ;;  %vm506_vm0 = vcmask 523264  }
   0xd   : > { %1383 = vset.pattern.permute.xlu1 %v1414_v6  ;;  %1385 = vset.pattern.permute.xlu0 %v1415_v7  ;;  %v498_v8 = vld [vmem:[%s2050_s2 + $0x40] sm:$0xff]  ;;  %v499_v9 = vld [vmem:[%s2050_s2 + $0x48] sm:$0xff]  ;;  %v496_v10 = vld [vmem:[%s2050_s2 + $0x30] sm:$0xff]  ;;  %s475_s22 = scalar_lea.vmem %s2048_s0, %s2063_s17  ;;  %s479_s25 = scalar_lea.vmem %s2049_s1, %s1334_s27  ;;  %v1416_v23 = vmov 1   ;;  %v1418_v24 = vmov 0   ;;  %v1423_v33 = vmov 8  }
   0xe   : > { %519 = vmatpush.msra.mxu0 %v502_v2  ;;  %539 = vmatpush.msra.mxu1 %v503_v3  ;;  %v1556_v11 = vld [vmem:[%s2052_s4] sm:$0xff]  ;;  %v497_v12 = vld [vmem:[%s2050_s2 + $0x38] sm:$0xff]  ;;  %v495_v15 = vld [vmem:[%s2050_s2 + $0x28] sm:$0xff]  ;;  %s1417_s27 = smov 17   ;;  %v1424_v34 = vmov 3   ;;  %v1426_v37 = vmov 5  }
   0xf   : > { %v1561_v13 = vld [vmem:[%s475_s22] sm:$0xff]  ;;  %556 = vperm.xlu1 %1383, %v1556_v11   ;;  %v492_v16 = vld [vmem:[%s2050_s2 + $0x10] sm:$0xff]  ;;  %v493_v17 = vld [vmem:[%s2050_s2 + $0x18] sm:$0xff]  ;;  %1382 = vset.pattern.permute.xlu2 %v1418_v24  ;;  %s1425_s22 = smov 113   ;;  %v1428_v40 = vmov 6   ;;  %v1430_v43 = vmov 7  }
  0x10   : > { %520 = vmatpush.msra.mxu0 %v500_v4  ;;  %540 = vmatpush.msra.mxu1 %v501_v5  ;;  %565 = vst [vmem:[#allocation1] ss:$2 sm:$0xff] %v1561_v13  ;;  %v494_v14 = vld [vmem:[%s2050_s2 + $0x20] sm:$0xff]  ;;  %v491_v19 = vld [vmem:[%s2050_s2 + $0x8] sm:$0xff]  ;;  %v1431_v47 = vmov 839922192  }
  0x11   : > { %v490_v18 = vld [vmem:[%s2050_s2] sm:$0xff]  ;;  %584 = vperm.xlu2 %1382, %v1556_v11   ;;  %v1625_v48 = vunpack.c.l.s4 %v1431_v47  ;;  %v1627_v49 = vand.u32 127, %v574_v45  ;;  %v1637_v51 = vld [vmem:[%s2051_s3 + $0x8] sm:$0xff]  ;;  %vm592_vm3 = vcmask 1043456   ;;  %vm925_vm10 = vcmask 31744   ;;  %s2064_s17 = sshll.u32 %s2066_s30, 3 }
  0x12   : > { %521 = vmatpush.msra.mxu0 %v498_v8  ;;  %541 = vmatpush.msra.mxu1 %v499_v9  ;;  %v489_v20 = vld [vmem:[%s479_s25] sm:$0xf]  ;;  %v1647_v56 = vperm.slane %v1637_v51, 0  ;;  %v1728_v47 = vperm.slane %v1637_v51, 3  ;;  %s484_s16 = scalar_lea.vmem %s2062_s14, %s2064_s17 }
  0x13   : > { %v1632_v50 = vld [vmem:[%s2051_s3] sm:$0xff]  ;;  %v560_v53 = vunpack.c.0.s8 %v1625_v48  ;;  %vm576_vm1 = vcmp.lt.s32.totalorder %v1627_v49, 17  ;;  %vm605_vm2 = vcmp.lt.s32.totalorder %v1627_v49, 16  ;;  %vm633_vm4 = vcmp.lt.s32.totalorder %v1627_v49, 15 }
  0x14   : > { %522 = vmatpush.msra.mxu0 %v496_v10  ;;  %542 = vmatpush.msra.mxu1 %v497_v12  ;;  %v1644_v55 = vperm.slane %v1632_v50, 0  ;;  %v1678_v10 = vperm.slane %v1632_v50, 1  ;;  %vm661_vm5 = vcmp.lt.s32.totalorder %v1627_v49, 1  ;;  %vm689_vm6 = vcmp.lt.s32.totalorder %v1627_v49, 127 }
  0x15   : > { %vm717_vm7 = vcmp.lt.s32.totalorder %v1627_v49, 113  ;;  %vm745_vm8 = vcmp.lt.s32.totalorder %v1627_v49, 112  ;;  %vm773_vm9 = vcmp.lt.s32.totalorder %v1627_v49, 111 }
  0x16   : > { %523 = vmatpush.msra.mxu0 %v494_v14  ;;  %543 = vmatpush.msra.mxu1 %v495_v15  ;;  %v1681_v15 = vperm.slane %v1637_v51, 1 }
  0x17   : > { %v566_v21 = vld.sshfl [vmem:[#allocation1] sm:$0xff pattern:$0x75316420]  ;;  %v567_v22 = vld.sshfl [vmem:[#allocation1 + $0x8] sm:$0xff pattern:$0x75316420]  ;;  %1384 = vset.pattern.permute.xlu1 %v1416_v23 }
  0x18   : > { %524 = vmatpush.msra.mxu0 %v492_v16  ;;  %544 = vmatpush.msra.mxu1 %v493_v17  ;;  %596 = vst [vmem:[#allocation1] ss:$2 sm:$0xff] %v1561_v13 }
  0x19   : > { %570 = vrot.lane.b32.xlu0 %v566_v21, %s1417_s27  ;;  %v1693_v21 = vperm.slane %v1637_v51, 2 }
  0x1a   : > { %525 = vmatpush.msra.mxu0 %v490_v18  ;;  %545 = vmatpush.msra.mxu1 %v491_v19 }
  0x1b   : > { %1337 = vmatmul.msk.f32.vlgmr.msra.gmra.mxu0 %vm506_vm0, %v489_v20  ;;  %1338 = vmatmul.msk.f32.vlgmr.msra.gmra.mxu1 %vm506_vm0, %v489_v20  ;;  %v1690_v20 = vperm.slane %v1632_v50, 2 }
  0x1f   : > { %v597_v25 = vld.sshfl [vmem:[#allocation1] sm:$0xff pattern:$0x75316420]  ;;  %v598_v26 = vld.sshfl [vmem:[#allocation1 + $0x8] sm:$0xff pattern:$0x75316420] }
  0x20   : > { %601 = vrot.lane.b32.xlu1 %v597_v25, %s1419_s18  ;;  %624 = vst [vmem:[#allocation1] ss:$2 sm:$0xff] %v1561_v13 }
  0x21   : > { %572 = vrot.lane.b32.xlu0 %v567_v22, %s1417_s27 }
  0x27   : > { %v626_v27 = vld.sshfl [vmem:[#allocation1 + $0x8] sm:$0xff pattern:$0x75316420]  ;;  %v625_v28 = vld.sshfl [vmem:[#allocation1] sm:$0xff pattern:$0x75316420] }
  0x28   : > { %603 = vrot.lane.b32.xlu1 %v598_v26, %s1419_s18  ;;  %652 = vst [vmem:[#allocation1] ss:$2 sm:$0xff] %v1561_v13  ;;  %629 = vrot.lane.b32.xlu2 %v625_v28, %s1420_s19 }
  0x29   : > { %631 = vrot.lane.b32.xlu0 %v626_v27, %s1420_s19 }
  0x2f   : > { %v653_v29 = vld.sshfl [vmem:[#allocation1] sm:$0xff pattern:$0x75316420]  ;;  %v654_v30 = vld.sshfl [vmem:[#allocation1 + $0x8] sm:$0xff pattern:$0x75316420] }
  0x30   : > { %613 = vperm.xlu1 %1384, %v1556_v11   ;;  %680 = vst [vmem:[#allocation1] ss:$2 sm:$0xff] %v1561_v13  ;;  %659 = vrot.lane.b32.xlu2 %v654_v30, %s1421_s20 }
  0x31   : > { %641 = vperm.xlu0 %1385, %v1556_v11  }
  0x37   : > { %v682_v31 = vld.sshfl [vmem:[#allocation1 + $0x8] sm:$0xff pattern:$0x75316420]  ;;  %v681_v32 = vld.sshfl [vmem:[#allocation1] sm:$0xff pattern:$0x75316420] }
  0x38   : > { %657 = vrot.lane.b32.xlu1 %v653_v29, %s1421_s20  ;;  %708 = vst [vmem:[#allocation1] ss:$2 sm:$0xff] %v1561_v13  ;;  %687 = vrot.lane.b32.xlu2 %v682_v31, %s1422_s21 }
  0x39   : > { %1390 = vset.pattern.permute.xlu1 %v1423_v33  ;;  %1386 = vset.pattern.permute.xlu0 %v1424_v34 }
  0x3a   : > { %669 = vperm.xlu0 %1386, %v1556_v11  }
  0x3f   : > { %v709_v35 = vld.sshfl [vmem:[#allocation1] sm:$0xff pattern:$0x75316420]  ;;  %v710_v36 = vld.sshfl [vmem:[#allocation1 + $0x8] sm:$0xff pattern:$0x75316420] }
  0x40   : > { %685 = vrot.lane.b32.xlu1 %v681_v32, %s1422_s21  ;;  %715 = vrot.lane.b32.xlu2 %v710_v36, %s1425_s22  ;;  %736 = vst [vmem:[#allocation1] ss:$2 sm:$0xff] %v1561_v13 }
  0x42   : > { %1387 = vset.pattern.permute.xlu0 %v1426_v37 }
  0x43   : > { %697 = vperm.xlu0 %1387, %v1556_v11  }
  0x47   : > { %v737_v38 = vld.sshfl [vmem:[#allocation1] sm:$0xff pattern:$0x75316420]  ;;  %v738_v39 = vld.sshfl [vmem:[#allocation1 + $0x8] sm:$0xff pattern:$0x75316420] }
  0x48   : > { %713 = vrot.lane.b32.xlu1 %v709_v35, %s1425_s22  ;;  %764 = vst [vmem:[#allocation1] ss:$2 sm:$0xff] %v1561_v13  ;;  %743 = vrot.lane.b32.xlu2 %v738_v39, %s1427_s23 }
  0x4b   : > { %1388 = vset.pattern.permute.xlu0 %v1428_v40 }
  0x4c   : > { %725 = vperm.xlu0 %1388, %v1556_v11  }
  0x4f   : > { %v765_v41 = vld.sshfl [vmem:[#allocation1] sm:$0xff pattern:$0x75316420]  ;;  %v766_v42 = vld.sshfl [vmem:[#allocation1 + $0x8] sm:$0xff pattern:$0x75316420] }
  0x50   : > { %741 = vrot.lane.b32.xlu1 %v737_v38, %s1427_s23  ;;  %771 = vrot.lane.b32.xlu2 %v766_v42, %s1429_s24 }
  0x54   : > { %1389 = vset.pattern.permute.xlu0 %v1430_v43 }
  0x58   : > { %769 = vrot.lane.b32.xlu1 %v765_v41, %s1429_s24 }
  0x60   : > { %781 = vperm.xlu1 %1390, %v1556_v11  }
  0x68   : > { %1391 = vset.pattern.permute.xlu1 %v1418_v24 }
  0x6b   : > { %v1639_v52 = vpop.permute.xlu2 %584 }
  0x81   : > { %v557_v44 = vpop.permute.xlu1 %556 }
  0x82   : > { %v802_v57 = vrot.slane %v557_v44, 4  ;;  %v561_v59 = vperm.slane %v557_v44, %v560_v53  ;;  %v630_v14 = vpop.permute.xlu2 %629 }
  0x84   : > { %v563_v8 = vmul.f32 %v561_v59, %v1561_v13 }
  0x8a   : > { %v660_v36 = vpop.permute.xlu2 %659 }
  0x8b   : > { %v571_v46 = vpop.permute.xlu0 %570 }
  0x92   : > { %v602_v54 = vpop.permute.xlu1 %601 }
  0x93   : > { %v573_v58 = vpop.permute.xlu0 %572 }
  0x94   : > { %v577_v60 = vsel %vm576_vm1, %v571_v46, %v573_v58  ;;  %v578_v61 = vsel %vm576_vm1, %v573_v58, %v571_v46  ;;  %v1725_v46 = vperm.slane %v1632_v50, 3 }
  0x95   : > { %v581_v0 = vmul.f32 %v1644_v55, %v578_v61  ;;  %v582_v1 = vmul.f32 %v1647_v56, %v577_v60 }
  0x97   : > { %v587_v4 = vmul.f32 %v1639_v52, %v581_v0  ;;  %v588_v5 = vmul.f32 %v1639_v52, %v582_v1 }
  0x98   : > { %v1655_v62 = vpop.f32.mrf.mxu0  ;;  %v1657_v63 = vpop.f32.mrf.mxu1 }
  0x99   : > { %808 = vrot.lane.b32.xlu0 %v1657_v63, %s1417_s27  ;;  %806 = vrot.lane.b32.xlu2 %v1655_v62, %s1417_s27  ;;  %v1666_v2 = vmul.f32 %v802_v57, %v1655_v62  ;;  %v1669_v3 = vmul.f32 %v802_v57, %v1657_v63  ;;  %v591_v9 = vrot.slane %v588_v5, 4  ;;  %v688_v5 = vpop.permute.xlu2 %687 }
  0x9a   : > { %834 = vrot.lane.b32.xlu1 %v1655_v62, %s1420_s19  ;;  %v604_v12 = vpop.permute.xlu1 %603 }
  0x9b   : > { %v606_v16 = vsel %vm605_vm2, %v602_v54, %v604_v12  ;;  %v607_v17 = vsel %vm605_vm2, %v604_v12, %v602_v54  ;;  %v593_v13 = vsel %vm592_vm3, %v587_v4, %v591_v9  ;;  %v632_v18 = vpop.permute.xlu0 %631  ;;  %v1749_v9 = vperm.slane %v1632_v50, 5 }
  0x9c   : > { %v595_v19 = vadd.f32 %v593_v13, %v563_v8  ;;  %v634_v22 = vsel %vm633_vm4, %v630_v14, %v632_v18  ;;  %v635_v25 = vsel %vm633_vm4, %v632_v18, %v630_v14  ;;  %v610_v26 = vmul.f32 %v1678_v10, %v607_v17 }
  0x9d   : > { %v611_v27 = vmul.f32 %v1681_v15, %v606_v16  ;;  %v638_v28 = vmul.f32 %v1690_v20, %v635_v25  ;;  %v639_v29 = vmul.f32 %v1693_v21, %v634_v22  ;;  %v1752_v12 = vperm.slane %v1637_v51, 5 }
  0xa1   : > { %822 = vrot.lane.b32.xlu0 %v1657_v63, %s1419_s18  ;;  %820 = vrot.lane.b32.xlu2 %v1655_v62, %s1419_s18 }
  0xa2   : > { %848 = vrot.lane.b32.xlu1 %v1655_v62, %s1421_s20  ;;  %v1709_v30 = vpop.permute.xlu1 %613 }
  0xa3   : > { %v616_v31 = vmul.f32 %v1709_v30, %v610_v26  ;;  %v617_v32 = vmul.f32 %v1709_v30, %v611_v27  ;;  %v1713_v35 = vpop.permute.xlu0 %641 }
  0xa4   : > { %v644_v39 = vmul.f32 %v1713_v35, %v638_v28  ;;  %v645_v41 = vmul.f32 %v1713_v35, %v639_v29  ;;  %v716_v28 = vpop.permute.xlu2 %715  ;;  %v1772_v29 = vperm.slane %v1632_v50, 6 }
  0xa5   : > { %v620_v38 = vrot.slane %v617_v32, 4 }
  0xa6   : > { %v648_v44 = vrot.slane %v645_v41, 4 }
  0xa7   : > { %v621_v42 = vsel %vm592_vm3, %v616_v31, %v620_v38  ;;  %v1775_v31 = vperm.slane %v1637_v51, 6 }
  0xa8   : > { %v623_v45 = vadd.f32 %v621_v42, %v595_v19  ;;  %v649_v54 = vsel %vm592_vm3, %v644_v39, %v648_v44 }
  0xa9   : > { %753 = vperm.xlu0 %1389, %v1556_v11   ;;  %836 = vrot.lane.b32.xlu2 %v1657_v63, %s1420_s19 }
  0xaa   : > { %862 = vrot.lane.b32.xlu1 %v1655_v62, %s1422_s21  ;;  %v651_v57 = vadd.f32 %v649_v54, %v623_v45  ;;  %v658_v11 = vpop.permute.xlu1 %657  ;;  %v552_v54 = vld [vmem:[%s2053_s5] sm:$0xff] }
  0xab   : > { %v662_v58 = vsel %vm661_vm5, %v658_v11, %v660_v36  ;;  %v663_v59 = vsel %vm661_vm5, %v660_v36, %v658_v11 }
  0xac   : > { %v666_v60 = vmul.f32 %v1725_v46, %v663_v59  ;;  %v667_v61 = vmul.f32 %v1728_v47, %v662_v58  ;;  %v1737_v0 = vpop.permute.xlu0 %669 }
  0xae   : > { %v672_v1 = vmul.f32 %v1737_v0, %v666_v60  ;;  %v673_v4 = vmul.f32 %v1737_v0, %v667_v61 }
  0xb0   : > { %v676_v8 = vrot.slane %v673_v4, 4  ;;  %v1806_v4 = vld [vmem:[%s2057_s9] sm:$0xf] }
  0xb1   : > { %906 = vrot.lane.b32.xlu0 %v1657_v63, %s1429_s24  ;;  %850 = vrot.lane.b32.xlu2 %v1657_v63, %s1421_s20 }
  0xb2   : > { %876 = vrot.lane.b32.xlu1 %v1655_v62, %s1425_s22  ;;  %1392 = vset.pattern.permute.xlu0 %v1418_v24  ;;  %v677_v14 = vsel %vm592_vm3, %v672_v1, %v676_v8  ;;  %v686_v16 = vpop.permute.xlu1 %685  ;;  %v1032_v1 = vld [vmem:[%s2056_s8] sm:$0xf] }
  0xb3   : > { %v679_v17 = vadd.f32 %v677_v14, %v651_v57  ;;  %v690_v13 = vsel %vm689_vm6, %v686_v16, %v688_v5  ;;  %v691_v18 = vsel %vm689_vm6, %v688_v5, %v686_v16  ;;  %v1813_v5 = vld [vmem:[%s2054_s6] sm:$0xf] }
  0xb4   : > { %v694_v19 = vmul.f32 %v1749_v9, %v690_v13  ;;  %v695_v22 = vmul.f32 %v1752_v12, %v691_v18 }
  0xb5   : > { %v1762_v25 = vpop.permute.xlu0 %697 }
  0xb6   : > { %v700_v26 = vmul.f32 %v1762_v25, %v694_v19  ;;  %v701_v27 = vmul.f32 %v1762_v25, %v695_v22 }
  0xb8   : > { %v704_v32 = vrot.slane %v701_v27, 4 }
  0xb9   : > { %864 = vrot.lane.b32.xlu2 %v1657_v63, %s1422_s21 }
  0xba   : > { %890 = vrot.lane.b32.xlu1 %v1655_v62, %s1427_s23  ;;  %v714_v36 = vpop.permute.xlu1 %713  ;;  %v705_v38 = vsel %vm592_vm3, %v700_v26, %v704_v32 }
  0xbb   : > { %v718_v39 = vsel %vm717_vm7, %v714_v36, %v716_v28  ;;  %v719_v41 = vsel %vm717_vm7, %v716_v28, %v714_v36  ;;  %v707_v42 = vadd.f32 %v705_v38, %v679_v17 }
  0xbc   : > { %v722_v44 = vmul.f32 %v1772_v29, %v718_v39  ;;  %v723_v45 = vmul.f32 %v1775_v31, %v719_v41 }
  0xbe   : > { %v1789_v57 = vpop.permute.xlu0 %725 }
  0xbf   : > { %v728_v11 = vmul.f32 %v1789_v57, %v722_v44  ;;  %v729_v58 = vmul.f32 %v1789_v57, %v723_v45  ;;  %v828_v44 = vrot.slane %v1709_v30, 4 }
  0xc1   : > { %878 = vrot.lane.b32.xlu2 %v1657_v63, %s1425_s22  ;;  %v732_v59 = vrot.slane %v729_v58, 4  ;;  %v1856_v58 = vperm.slane %v1632_v50, 7 }
  0xc2   : > { %794 = vperm.xlu1 %1391, %v552_v54  }
  0xc3   : > { %v733_v60 = vsel %vm592_vm3, %v728_v11, %v732_v59 }
  0xc4   : > { %v1794_v61 = vadd.f32 %v733_v60, %v707_v42 }
  0xc9   : > { %892 = vrot.lane.b32.xlu2 %v1657_v63, %s1427_s23 }
  0xca   : > { %1035 = vperm.xlu1 %1391, %v1032_v1  }
  0xd1   : > { %904 = vrot.lane.b32.xlu2 %v1655_v62, %s1429_s24  ;;  %v744_v62 = vpop.permute.xlu2 %743 }
  0xd2   : > { %1393 = vset.pattern.permute.xlu1 %v1414_v6  ;;  %v742_v6 = vpop.permute.xlu1 %741 }
  0xd3   : > { %1045 = vperm.xlu1 %1393, %v1806_v4   ;;  %v746_v59 = vsel %vm745_vm8, %v742_v6, %v744_v62 }
  0xd9   : > { %923 = vrot.lane.b32.xlu2 %v1813_v5, %s1432_s26  ;;  %v1818_v63 = vpop.permute.xlu2 %771 }
  0xda   : > { %v1824_v14 = vpop.permute.xlu1 %769 }
  0xdb   : > { %1401 = vset.pattern.permute.xlu1 %v1418_v24 }
  0xe1   : > { %1059 = vperm.xlu2 %1382, %v1806_v4  }
  0xe2   : > { %v1828_v13 = vpop.permute.xlu1 %781 }
  0xe9   : > { %1394 = vset.pattern.permute.xlu2 %v1416_v23 }
  0xea   : > { %1075 = vperm.xlu2 %1394, %v1806_v4  }
  0xf2   : > { %1395 = vset.pattern.permute.xlu2 %v1415_v7 }
  0xf3   : > { %v807_v8 = vpop.permute.xlu2 %806  ;;  %1091 = vperm.xlu2 %1395, %v1806_v4  }
  0xfb   : > { %v821_v16 = vpop.permute.xlu2 %820  ;;  %1396 = vset.pattern.permute.xlu2 %v1424_v34  ;;  %v814_v34 = vrot.slane %v1639_v52, 4 }
  0xfc   : > { %1107 = vperm.xlu2 %1396, %v1806_v4  }
 0x103   : > { %v837_v17 = vpop.permute.xlu2 %836 }
 0x104   : > { %1397 = vset.pattern.permute.xlu2 %v1426_v37 }
 0x105   : > { %1123 = vperm.xlu2 %1397, %v1806_v4  }
 0x10b   : > { %v809_v23 = vpop.permute.xlu0 %808  ;;  %v851_v18 = vpop.permute.xlu2 %850 }
 0x10c   : > { %v810_v7 = vsel %vm576_vm1, %v807_v8, %v809_v23  ;;  %v811_v19 = vsel %vm576_vm1, %v809_v23, %v807_v8  ;;  %v835_v22 = vpop.permute.xlu1 %834 }
 0x10d   : > { %v812_v26 = vmul.f32 %v811_v19, %v1644_v55  ;;  %v813_v27 = vmul.f32 %v810_v7, %v1647_v56  ;;  %1398 = vset.pattern.permute.xlu2 %v1428_v40  ;;  %v838_v19 = vsel %vm633_vm4, %v835_v22, %v837_v17  ;;  %v839_v50 = vsel %vm633_vm4, %v837_v17, %v835_v22 }
 0x10e   : > { %v842_v17 = vrot.slane %v1713_v35, 4  ;;  %v775_v35 = vsel %vm773_vm9, %v1818_v63, %v1824_v14 }
 0x10f   : > { %v816_v37 = vmul.f32 %v814_v34, %v812_v26  ;;  %v817_v28 = vmul.f32 %v814_v34, %v813_v27  ;;  %v840_v34 = vmul.f32 %v839_v50, %v1690_v20  ;;  %v841_v26 = vmul.f32 %v838_v19, %v1693_v21 }
 0x111   : > { %v818_v32 = vadd.f32 %v816_v37, %v1666_v2  ;;  %v819_v36 = vadd.f32 %v817_v28, %v1669_v3  ;;  %v1851_v2 = vperm.slane %v1637_v51, 7  ;;  %v747_v3 = vsel %vm745_vm8, %v744_v62, %v742_v6 }
 0x112   : > { %v750_v51 = vmul.f32 %v1856_v58, %v746_v59  ;;  %v870_v59 = vrot.slane %v1762_v25, 4 }
 0x113   : > { %v823_v38 = vpop.permute.xlu0 %822  ;;  %v865_v39 = vpop.permute.xlu2 %864  ;;  %v751_v1 = vmul.f32 %v1851_v2, %v747_v3 }
 0x114   : > { %v824_v41 = vsel %vm605_vm2, %v821_v16, %v823_v38  ;;  %v825_v52 = vsel %vm605_vm2, %v823_v38, %v821_v16  ;;  %v849_v42 = vpop.permute.xlu1 %848  ;;  %v1024_v38 = vld [vmem:[%s2055_s7] sm:$0xf] }
 0x115   : > { %v826_v40 = vmul.f32 %v825_v52, %v1678_v10  ;;  %v827_v45 = vmul.f32 %v824_v41, %v1681_v15  ;;  %v852_v37 = vsel %vm661_vm5, %v849_v42, %v851_v18  ;;  %v853_v28 = vsel %vm661_vm5, %v851_v18, %v849_v42  ;;  %v1892_v41 = vld [vmem:[%s2051_s3 + $0x18] ss:$0 sm:$0xff]  ;;  %1027 = vperm.xlu0 %1392, %v1024_v38  }
 0x116   : > { %v844_v18 = vmul.f32 %v842_v17, %v840_v34  ;;  %v845_v52 = vmul.f32 %v842_v17, %v841_v26  ;;  %v855_v42 = vmul.f32 %v852_v37, %v1728_v47  ;;  %v884_v34 = vrot.slane %v1789_v57, 4 }
 0x117   : > { %v830_v54 = vmul.f32 %v828_v44, %v826_v40  ;;  %v831_v11 = vmul.f32 %v828_v44, %v827_v45 }
 0x119   : > { %v832_v60 = vadd.f32 %v830_v54, %v818_v32  ;;  %v833_v30 = vadd.f32 %v831_v11, %v819_v36  ;;  %v856_v11 = vrot.slane %v1737_v0, 4 }
 0x11b   : > { %v1861_v8 = vpop.permute.xlu0 %753  ;;  %v879_v16 = vpop.permute.xlu2 %878  ;;  %v847_v19 = vadd.f32 %v845_v52, %v833_v30  ;;  %v859_v25 = vmul.f32 %v856_v11, %v855_v42 }
 0x11c   : > { %v757_v23 = vmul.f32 %v1861_v8, %v751_v1  ;;  %v863_v7 = vpop.permute.xlu1 %862  ;;  %v756_v62 = vmul.f32 %v1861_v8, %v750_v51  ;;  %v1911_v1 = vld [vmem:[%s2051_s3 + $0x10] ss:$0 sm:$0xff]  ;;  %v774_v51 = vsel %vm773_vm9, %v1824_v14, %v1818_v63  ;;  %v898_v14 = vrot.slane %v1861_v8, 4 }
 0x11d   : > { %v866_v22 = vsel %vm689_vm6, %v863_v7, %v865_v39  ;;  %v867_v36 = vsel %vm689_vm6, %v865_v39, %v863_v7  ;;  %v854_v39 = vmul.f32 %v853_v28, %v1725_v46  ;;  %v846_v7 = vadd.f32 %v844_v18, %v832_v60  ;;  %1400 = vset.pattern.permute.xlu0 %v1423_v33 }
 0x11e   : > { %v760_v6 = vrot.slane %v757_v23, 4  ;;  %v868_v40 = vmul.f32 %v866_v22, %v1749_v9  ;;  %v869_v45 = vmul.f32 %v867_v36, %v1752_v12  ;;  %v779_v23 = vmul.f32 %v1892_v41, %v775_v35 }
 0x11f   : > { %v858_v50 = vmul.f32 %v856_v11, %v854_v39  ;;  %v778_v26 = vmul.f32 %v1911_v1, %v774_v51  ;;  %v861_v63 = vadd.f32 %v859_v25, %v847_v19 }
 0x120   : > { %v761_v27 = vsel %vm592_vm3, %v756_v62, %v760_v6  ;;  %v872_v62 = vmul.f32 %v870_v59, %v868_v40  ;;  %v873_v6 = vmul.f32 %v870_v59, %v869_v45  ;;  %v912_v45 = vrot.slane %v1828_v13, 4 }
 0x121   : > { %v1879_v32 = vadd.f32 %v761_v27, %v1794_v61  ;;  %v785_v27 = vmul.f32 %v1828_v13, %v779_v23  ;;  %v860_v37 = vadd.f32 %v858_v50, %v846_v7 }
 0x122   : > { %v875_v35 = vadd.f32 %v873_v6, %v861_v63 }
 0x123   : > { %v893_v61 = vpop.permute.xlu2 %892  ;;  %v907_v60 = vpop.permute.xlu0 %906  ;;  %v874_v38 = vadd.f32 %v872_v62, %v860_v37  ;;  %v788_v40 = vrot.slane %v785_v27, 4 }
 0x124   : > { %v877_v44 = vpop.permute.xlu1 %876 }
 0x125   : > { %v880_v3 = vsel %vm717_vm7, %v877_v44, %v879_v16  ;;  %v881_v54 = vsel %vm717_vm7, %v879_v16, %v877_v44  ;;  %v784_v44 = vmul.f32 %v1828_v13, %v778_v26 }
 0x126   : > { %v882_v16 = vmul.f32 %v880_v3, %v1772_v29  ;;  %v883_v0 = vmul.f32 %v881_v54, %v1775_v31 }
 0x127   : > { %v789_v19 = vsel %vm592_vm3, %v784_v44, %v788_v40 }
 0x128   : > { %v886_v28 = vmul.f32 %v884_v34, %v882_v16  ;;  %v887_v17 = vmul.f32 %v884_v34, %v883_v0  ;;  %v791_v25 = vadd.f32 %v789_v19, %v1879_v32 }
 0x12a   : > { %v888_v3 = vadd.f32 %v886_v28, %v874_v38  ;;  %v889_v54 = vadd.f32 %v887_v17, %v875_v35 }
 0x12b   : > { %v905_v30 = vpop.permute.xlu2 %904 }
 0x12c   : > { %v908_v22 = vsel %vm773_vm9, %v905_v30, %v907_v60  ;;  %v909_v57 = vsel %vm773_vm9, %v907_v60, %v905_v30  ;;  %v891_v36 = vpop.permute.xlu1 %890 }
 0x12d   : > { %v894_v18 = vsel %vm745_vm8, %v891_v36, %v893_v61  ;;  %v895_v8 = vsel %vm745_vm8, %v893_v61, %v891_v36  ;;  %v910_v52 = vmul.f32 %v1911_v1, %v908_v22  ;;  %v911_v33 = vmul.f32 %v1892_v41, %v909_v57 }
 0x12e   : > { %v896_v39 = vmul.f32 %v894_v18, %v1856_v58  ;;  %v897_v42 = vmul.f32 %v895_v8, %v1851_v2 }
 0x12f   : > { %v914_v51 = vmul.f32 %v912_v45, %v910_v52  ;;  %v915_v23 = vmul.f32 %v912_v45, %v911_v33 }
 0x130   : > { %v900_v11 = vmul.f32 %v898_v14, %v896_v39  ;;  %v901_v59 = vmul.f32 %v898_v14, %v897_v42 }
 0x132   : > { %v902_v61 = vadd.f32 %v900_v11, %v888_v3  ;;  %v903_v7 = vadd.f32 %v901_v59, %v889_v54 }
 0x133   : > { %v924_v27 = vpop.permute.xlu2 %923 }
 0x134   : > { %v795_v16 = vpop.permute.xlu1 %794  ;;  %v916_v0 = vadd.f32 %v914_v51, %v902_v61  ;;  %v917_v50 = vadd.f32 %v915_v23, %v903_v7 }
 0x135   : > { %v799_v62 = vperm.slane %v795_v16, %v560_v53  ;;  %v918_v6 = vrot.slane %v795_v16, 4 }
 0x137   : > { %v801_v13 = vadd.f32 %v799_v62, %v791_v25  ;;  %v920_v34 = vadd.f32 %v918_v6, %v916_v0  ;;  %v921_v26 = vadd.f32 %v918_v6, %v917_v50  ;;  %v1236_v0 = vld [vmem:[%s2060_s12] sm:$0xf] }
 0x139   : > { %975 = vst [vmem:[#allocation1] ss:$2 sm:$0xff] %v801_v13  ;;  %1339 = vmatpush.msk.msra.mxu2 %vm592_vm3, %v920_v34  ;;  %1341 = vmatpush.msk.msra.mxu3 %vm592_vm3, %v921_v26 }
 0x13a   : > { %1340 = vmatmul.msk.f32.vlgmr.msra.gmra.mxu2 %vm925_vm10, %v924_v27  ;;  %1342 = vmatmul.msk.f32.vlgmr.msra.gmra.mxu3 %vm925_vm10, %v924_v27 }
 0x13b   : > { %v1060_v8 = vpop.permute.xlu2 %1059 }
 0x13c   : > { %v1036_v57 = vpop.permute.xlu1 %1035 }
 0x140   : > { %v976_v37 = vld.sshfl [vmem:[#allocation1] sm:$0xff pattern:$0x75316420]  ;;  %v977_v32 = vld.sshfl [vmem:[#allocation1 + $0x8] sm:$0xff pattern:$0x75316420] }
 0x141   : > { %1343 = vmatpush.msk.msrb.mxu2 %vm592_vm3, %v976_v37  ;;  %1345 = vmatpush.msk.msrb.mxu3 %vm592_vm3, %v977_v32 }
 0x142   : > { %1344 = vmatmul.msk.f32.vlgmr.msrb.gmra.mxu2 %vm925_vm10, %v1813_v5  ;;  %1346 = vmatmul.msk.f32.vlgmr.msrb.gmra.mxu3 %vm925_vm10, %v1813_v5  ;;  %v1244_v5 = vld [vmem:[%s2061_s13] sm:$0xf] }
 0x144   : > { %v1076_v52 = vpop.permute.xlu2 %1075 }
 0x145   : > { %v1046_v39 = vpop.permute.xlu1 %1045 }
 0x14d   : > { %v1092_v33 = vpop.permute.xlu2 %1091 }
 0x156   : > { %v1108_v40 = vpop.permute.xlu2 %1107 }
 0x15f   : > { %v1124_v54 = vpop.permute.xlu2 %1123 }
 0x187   : > { %v1028_v63 = vpop.permute.xlu0 %1027 }
 0x1bd   : > { %v951_v48 = vpop.f32.mrf.mxu2  ;;  %v971_v53 = vpop.f32.mrf.mxu3 }
 0x1c5   : > { %v1001_v14 = vpop.f32.mrf.mxu2  ;;  %v1021_v60 = vpop.f32.mrf.mxu3 }
 0x1c6   : > { %v1002_v30 = vadd.f32 %v1001_v14, %v951_v48  ;;  %v1022_v28 = vadd.f32 %v1021_v60, %v971_v53 }
 0x1c8   : > { %v1030_v17 = vmul.f32 %v1028_v63, %v1002_v30  ;;  %v1031_v22 = vmul.f32 %v1028_v63, %v1022_v28 }
 0x1ca   : > { %v1038_v36 = vadd.f32 %v1036_v57, %v1030_v17  ;;  %v1039_v38 = vadd.f32 %v1036_v57, %v1031_v22 }
 0x1cc   : > { %v1040_v35 = vmax.f32 %v1038_v36, 0.0  ;;  %v1041_v18 = vmax.f32 %v1039_v38, 0.0 }
 0x1ce   : > { %1068 = vrot.lane.b32.xlu0 %v1041_v18, %s1419_s18  ;;  %1052 = vrot.lane.b32.xlu1 %v1041_v18, %s1417_s27  ;;  %v1048_v37 = vmul.f32 %v1046_v39, %v1040_v35  ;;  %v1049_v32 = vmul.f32 %v1046_v39, %v1041_v18 }
 0x1cf   : > { %1050 = vrot.lane.b32.xlu2 %v1040_v35, %s1417_s27 }
 0x1d6   : > { %1084 = vrot.lane.b32.xlu1 %v1041_v18, %s1420_s19  ;;  %1082 = vrot.lane.b32.xlu0 %v1040_v35, %s1420_s19 }
 0x1d7   : > { %1066 = vrot.lane.b32.xlu2 %v1040_v35, %s1419_s18 }
 0x1de   : > { %1100 = vrot.lane.b32.xlu1 %v1041_v18, %s1421_s20  ;;  %1098 = vrot.lane.b32.xlu0 %v1040_v35, %s1421_s20 }
 0x1df   : > { %1139 = vperm.xlu2 %1398, %v1806_v4  }
 0x1e6   : > { %1116 = vrot.lane.b32.xlu1 %v1041_v18, %s1422_s21  ;;  %1114 = vrot.lane.b32.xlu0 %v1040_v35, %s1422_s21 }
 0x1e7   : > { %1399 = vset.pattern.permute.xlu2 %v1430_v43  ;;  %v1178_v43 = vld [vmem:[%s2058_s10] sm:$0xf] }
 0x1e8   : > { %1155 = vperm.xlu2 %1399, %v1806_v4  }
 0x1ee   : > { %1132 = vrot.lane.b32.xlu1 %v1041_v18, %s1425_s22  ;;  %1130 = vrot.lane.b32.xlu0 %v1040_v35, %s1425_s22 }
 0x1f0   : > { %1402 = vset.pattern.permute.xlu2 %v1418_v24 }
 0x1f1   : > { %1239 = vperm.xlu2 %1402, %v1236_v0  }
 0x1f6   : > { %1148 = vrot.lane.b32.xlu1 %v1041_v18, %s1427_s23  ;;  %1146 = vrot.lane.b32.xlu0 %v1040_v35, %s1427_s23 }
 0x1fe   : > { %1164 = vrot.lane.b32.xlu1 %v1041_v18, %s1429_s24  ;;  %1162 = vrot.lane.b32.xlu0 %v1040_v35, %s1429_s24 }
 0x206   : > { %1181 = vperm.xlu1 %1401, %v1178_v43   ;;  %1171 = vperm.xlu0 %1400, %v1806_v4  }
 0x20e   : > { %1247 = vperm.xlu1 %1401, %v1244_v5   ;;  %1403 = vset.pattern.permute.xlu0 %v1418_v24 }
 0x229   : > { %v1051_v4 = vpop.permute.xlu2 %1050 }
 0x231   : > { %v1067_v61 = vpop.permute.xlu2 %1066 }
 0x239   : > { %v1140_v48 = vpop.permute.xlu2 %1139 }
 0x240   : > { %v1069_v42 = vpop.permute.xlu0 %1068  ;;  %v1053_v44 = vpop.permute.xlu1 %1052 }
 0x241   : > { %v1054_v7 = vsel %vm576_vm1, %v1051_v4, %v1053_v44  ;;  %v1055_v24 = vsel %vm576_vm1, %v1053_v44, %v1051_v4  ;;  %v1070_v62 = vsel %vm605_vm2, %v1067_v61, %v1069_v42  ;;  %v1071_v6 = vsel %vm605_vm2, %v1069_v42, %v1067_v61 }
 0x242   : > { %v1056_v50 = vmul.f32 %v1055_v24, %v1644_v55  ;;  %v1057_v25 = vmul.f32 %v1054_v7, %v1647_v56  ;;  %v1072_v55 = vmul.f32 %v1071_v6, %v1678_v10  ;;  %v1073_v56 = vmul.f32 %v1070_v62, %v1681_v15  ;;  %v1156_v61 = vpop.permute.xlu2 %1155 }
 0x244   : > { %v1062_v26 = vmul.f32 %v1060_v8, %v1056_v50  ;;  %v1063_v27 = vmul.f32 %v1060_v8, %v1057_v25  ;;  %v1078_v57 = vmul.f32 %v1076_v52, %v1072_v55 }
 0x246   : > { %v1064_v17 = vadd.f32 %v1062_v26, %v1048_v37  ;;  %v1065_v22 = vadd.f32 %v1063_v27, %v1049_v32 }
 0x248   : > { %v1085_v45 = vpop.permute.xlu1 %1084  ;;  %v1083_v3 = vpop.permute.xlu0 %1082  ;;  %v1080_v39 = vadd.f32 %v1078_v57, %v1064_v17 }
 0x249   : > { %v1086_v13 = vsel %vm633_vm4, %v1083_v3, %v1085_v45  ;;  %v1087_v34 = vsel %vm633_vm4, %v1085_v45, %v1083_v3 }
 0x24a   : > { %v1088_v53 = vmul.f32 %v1087_v34, %v1690_v20  ;;  %v1089_v63 = vmul.f32 %v1086_v13, %v1693_v21  ;;  %v1079_v20 = vmul.f32 %v1076_v52, %v1073_v56 }
 0x24c   : > { %v1094_v38 = vmul.f32 %v1092_v33, %v1088_v53  ;;  %v1095_v35 = vmul.f32 %v1092_v33, %v1089_v63  ;;  %v1081_v42 = vadd.f32 %v1079_v20, %v1065_v22 }
 0x24e   : > { %v1096_v3 = vadd.f32 %v1094_v38, %v1080_v39 }
 0x250   : > { %v1101_v11 = vpop.permute.xlu1 %1100  ;;  %v1099_v59 = vpop.permute.xlu0 %1098 }
 0x251   : > { %v1102_v14 = vsel %vm661_vm5, %v1099_v59, %v1101_v11  ;;  %v1103_v60 = vsel %vm661_vm5, %v1101_v11, %v1099_v59  ;;  %v1097_v11 = vadd.f32 %v1095_v35, %v1081_v42 }
 0x252   : > { %v1104_v21 = vmul.f32 %v1103_v60, %v1725_v46  ;;  %v1105_v36 = vmul.f32 %v1102_v14, %v1728_v47 }
 0x254   : > { %v1110_v47 = vmul.f32 %v1108_v40, %v1104_v21  ;;  %v1111_v33 = vmul.f32 %v1108_v40, %v1105_v36 }
 0x256   : > { %v1112_v7 = vadd.f32 %v1110_v47, %v1096_v3  ;;  %v1113_v24 = vadd.f32 %v1111_v33, %v1097_v11 }
 0x258   : > { %v1117_v51 = vpop.permute.xlu1 %1116  ;;  %v1115_v23 = vpop.permute.xlu0 %1114 }
 0x259   : > { %v1118_v10 = vsel %vm689_vm6, %v1115_v23, %v1117_v51  ;;  %v1119_v15 = vsel %vm689_vm6, %v1117_v51, %v1115_v23 }
 0x25a   : > { %v1120_v5 = vmul.f32 %v1118_v10, %v1749_v9  ;;  %v1121_v8 = vmul.f32 %v1119_v15, %v1752_v12 }
 0x25c   : > { %v1126_v9 = vmul.f32 %v1124_v54, %v1120_v5  ;;  %v1127_v4 = vmul.f32 %v1124_v54, %v1121_v8 }
 0x25e   : > { %v1129_v40 = vadd.f32 %v1127_v4, %v1113_v24  ;;  %v1128_v0 = vadd.f32 %v1126_v9, %v1112_v7 }
 0x260   : > { %v1133_v19 = vpop.permute.xlu1 %1132  ;;  %v1131_v16 = vpop.permute.xlu0 %1130 }
 0x261   : > { %v1134_v18 = vsel %vm717_vm7, %v1131_v16, %v1133_v19  ;;  %v1135_v43 = vsel %vm717_vm7, %v1133_v19, %v1131_v16 }
 0x262   : > { %v1136_v44 = vmul.f32 %v1134_v18, %v1772_v29  ;;  %v1137_v45 = vmul.f32 %v1135_v43, %v1775_v31 }
 0x264   : > { %v1142_v19 = vmul.f32 %v1140_v48, %v1136_v44  ;;  %v1143_v16 = vmul.f32 %v1140_v48, %v1137_v45  ;;  %v1186_v48 = vld [vmem:[%s2059_s11] sm:$0xf] }
 0x266   : > { %v1144_v25 = vadd.f32 %v1142_v19, %v1128_v0 }
 0x268   : > { %v1149_v30 = vpop.permute.xlu1 %1148  ;;  %v1147_v28 = vpop.permute.xlu0 %1146 }
 0x269   : > { %v1150_v52 = vsel %vm745_vm8, %v1147_v28, %v1149_v30  ;;  %v1151_v46 = vsel %vm745_vm8, %v1149_v30, %v1147_v28 }
 0x26a   : > { %v1152_v12 = vmul.f32 %v1150_v52, %v1856_v58  ;;  %v1153_v51 = vmul.f32 %v1151_v46, %v1851_v2  ;;  %v1145_v58 = vadd.f32 %v1143_v16, %v1129_v40 }
 0x26c   : > { %v1158_v50 = vmul.f32 %v1156_v61, %v1152_v12  ;;  %v1159_v54 = vmul.f32 %v1156_v61, %v1153_v51 }
 0x26e   : > { %v1160_v13 = vadd.f32 %v1158_v50, %v1144_v25  ;;  %v1161_v34 = vadd.f32 %v1159_v54, %v1145_v58 }
 0x270   : > { %v1163_v59 = vpop.permute.xlu0 %1162  ;;  %v1165_v23 = vpop.permute.xlu1 %1164 }
 0x271   : > { %v1166_v29 = vsel %vm773_vm9, %v1163_v59, %v1165_v23  ;;  %v1167_v31 = vsel %vm773_vm9, %v1165_v23, %v1163_v59 }
 0x272   : > { %v1168_v2 = vmul.f32 %v1911_v1, %v1166_v29  ;;  %v1169_v62 = vmul.f32 %v1892_v41, %v1167_v31  ;;  %v1240_v41 = vpop.permute.xlu2 %1239 }
 0x278   : > { %v1172_v6 = vpop.permute.xlu0 %1171  ;;  %v1182_v55 = vpop.permute.xlu1 %1181 }
 0x279   : > { %v1174_v26 = vmul.f32 %v1172_v6, %v1168_v2  ;;  %v1175_v27 = vmul.f32 %v1172_v6, %v1169_v62 }
 0x27b   : > { %v1176_v37 = vadd.f32 %v1174_v26, %v1160_v13  ;;  %v1177_v32 = vadd.f32 %v1175_v27, %v1161_v34 }
 0x27d   : > { %v1184_v49 = vadd.f32 %v1182_v55, %v1176_v37  ;;  %v1185_v56 = vadd.f32 %v1182_v55, %v1177_v32 }
 0x27f   : > { %1347 = vmatpush.msk.msra.mxu2 %vm592_vm3, %v1184_v49  ;;  %1349 = vmatpush.msk.msra.mxu3 %vm592_vm3, %v1185_v56 }
 0x280   : > { %1348 = vmatmul.msk.f32.vlgmr.msra.gmra.mxu2 %vm925_vm10, %v1186_v48  ;;  %1350 = vmatmul.msk.f32.vlgmr.msra.gmra.mxu3 %vm925_vm10, %v1186_v48  ;;  %v1248_v60 = vpop.permute.xlu1 %1247 }
 0x303   : > { %v1233_v1 = vpop.f32.mrf.mxu3  ;;  %v1213_v53 = vpop.f32.mrf.mxu2 }
 0x304   : > { %v1243_v63 = vmul.f32 %v1240_v41, %v1233_v1  ;;  %v1242_v14 = vmul.f32 %v1240_v41, %v1213_v53 }
 0x306   : > { %v1251_v30 = vadd.f32 %v1248_v60, %v1243_v63  ;;  %v1250_v28 = vadd.f32 %v1248_v60, %v1242_v14 }
 0x308   : > { %v1253_v17 = vmax.f32 %v1251_v30, 0.0  ;;  %v1252_v10 = vmax.f32 %v1250_v28, 0.0 }
 0x30a   : > { %v1256_v22 = vrot.slane %v1253_v17, 4 }
 0x30c   : > { %v1257_v15 = vsel %vm592_vm3, %v1252_v10, %v1256_v22 }
 0x30d   : > { %1259 = vst [vmem:[%s484_s16] sm:$0xff] %v1257_v15 }
 0x30e PF: > { %s24_s29 = sadd.s32 1, %s1412_s29  }
 0x30f   : > { %p21_p4 = scmp.ge.s32.totalorder %s24_s29, 4  }
 0x311   :  { %23 = sbr.rel (!%p21_p4) target bundleno = 1 (0x1), region = 109 }

</bundles_post_ra>
